<compile_context>
chip_gen: v6e
topology: v6e:2x2x1
jax: 0.10.0
libtpu: 0.0.40
codegen_flags: <defaults>
</compile_context>

<pallas_src>
import functools

import jax
import jax.numpy as jnp
import numpy as np
from jax.experimental import pallas as pl
from jax.experimental.pallas import tpu as pltpu


# ---------------------------------------------------------------------------
# Host-built 0/1 "layout" matrices (one set per spatial shape).  They turn
# zero-padding, garbage-column dropping, and valid extraction into MXU matmuls,
# so the kernel needs no scratch buffers, no zero fills and no masked stores.
# ---------------------------------------------------------------------------
def _pad_scatter(h, w, pad, ks):
    """(h*w, Hp*Wp + ks-1): unpadded flat row-major -> zero-padded flat (+slack)."""
    hp, wp = h + 2 * pad, w + 2 * pad
    f = hp * wp + ks - 1
    m = np.zeros((h * w, f), np.float32)
    for r in range(h):
        for c in range(w):
            m[r * w + c, (r + pad) * wp + (c + pad)] = 1.0
    return m


def _wide_to_pad_scatter(ho, wo, wp_in, pad, ks):
    """(ho*wp_in, Hp'*Wp' + ks-1): 'wide' conv output -> zero-padded flat input
    of the next conv.  Garbage columns (c >= wo) get all-zero rows -> dropped."""
    hp, wpn = ho + 2 * pad, wo + 2 * pad
    f = hp * wpn + ks - 1
    m = np.zeros((ho * wp_in, f), np.float32)
    for r in range(ho):
        for c in range(wo):
            m[r * wp_in + c, (r + pad) * wpn + (c + pad)] = 1.0
    return m


def _wide_to_valid(ho, wo, wp_in):
    """(ho*wp_in, ho*wo): 'wide' conv output -> valid NCHW-flat output."""
    m = np.zeros((ho * wp_in, ho * wo), np.float32)
    for r in range(ho):
        for c in range(wo):
            m[r * wp_in + c, r * wo + c] = 1.0
    return m


# ---------------------------------------------------------------------------
# Fused kernel: relu(conv2(conv1(x))) for ONE image, entirely in vregs/VMEM.
# All tensors are (channels, flattened-spatial) with spatial on the lane axis.
# ---------------------------------------------------------------------------
def _fused_conv2_kernel(x_ref, w1_ref, b1_ref, s0_ref, w2_ref, b2_ref,
                        p1_ref, p2_ref, o_ref, *,
                        ks1, ks2, wp1, wp2, l1, l2, apply_relu):
    """
    x_ref:  (1, Cin, H*W)        lane-dense NCHW-flat input
    w1_ref: (ks1*ks1, C1, Cin)   per-tap weight (Cout, Cin) matrices
    b1_ref: (C1, 1)
    s0_ref: (H*W, F1)            0/1: unpadded flat -> padded flat (layer 1)
    w2_ref: (ks2*ks2, C2, C1)
    b2_ref: (C2, 1)
    p1_ref: (L1, F2)             0/1: wide layer-1 out -> padded layer-2 in
    p2_ref: (L2, Ho2*Wo2)        0/1: wide layer-2 out -> valid NCHW-flat out
    o_ref:  (1, C2, Ho2*Wo2)     lane-dense NCHW-flat output (256 lanes)
    """
    c1 = w1_ref.shape[1]
    c2 = w2_ref.shape[1]

    x = x_ref[0].astype(jnp.float32)                       # (Cin, H*W)

    # ------------- layer 1 -------------
    # Zero-pad via one MXU matmul (no scratch zero-fill, no masked stores).
    xp1 = jnp.dot(x, s0_ref[...], preferred_element_type=jnp.float32)   # (Cin, F1)

    # Each tap is a static lane-slice of the flat padded row; accumulate
    # (C1, L1) = W_tap(C1, Cin) @ slice(Cin, L1) on the MXU (f32 accumulate).
    acc1 = jnp.zeros((c1, l1), jnp.float32)
    for kh in range(ks1):
        for kw in range(ks1):
            off = kh * wp1 + kw
            acc1 = acc1 + jnp.dot(w1_ref[kh * ks1 + kw],
                                  xp1[:, off:off + l1],
                                  preferred_element_type=jnp.float32)
    acc1 = acc1 + b1_ref[...]        # bias before re-padding; halo stays zero
    # NOTE: no activation between the two convs (module applies it once, after
    # the conv stack).

    # ------------- layer 2 -------------
    # Drop the wide-output garbage columns AND zero-pad for conv 2 in one matmul.
    xp2 = jnp.dot(acc1, p1_ref[...], preferred_element_type=jnp.float32)  # (C1, F2)

    acc2 = jnp.zeros((c2, l2), jnp.float32)
    for kh in range(ks2):
        for kw in range(ks2):
            off = kh * wp2 + kw
            acc2 = acc2 + jnp.dot(w2_ref[kh * ks2 + kw],
                                  xp2[:, off:off + l2],
                                  preferred_element_type=jnp.float32)

    # Extract the valid columns -> (C2, Ho2*Wo2), already NCHW-flat + lane-dense.
    out = jnp.dot(acc2, p2_ref[...], preferred_element_type=jnp.float32)
    out = out + b2_ref[...]
    if apply_relu:
        out = jnp.maximum(out, 0.0)

    o_ref[...] = out[None].astype(o_ref.dtype)


# ---------------------------------------------------------------------------
# Wrapper
# ---------------------------------------------------------------------------
def conv2d_block_forward(x_nchw, w1t, b1, w2t, b2, s0, p1, p2, *,
                         ks1, ks2, pad1, pad2, apply_relu=True):
    """Fused Conv2dBlock forward: relu(conv2(conv1(x))). NCHW in / NCHW out."""
    N, Cin, H, W = x_nchw.shape
    C1 = w1t.shape[1]
    C2 = w2t.shape[1]
    Ho1, Wo1 = H + 2 * pad1 - ks1 + 1, W + 2 * pad1 - ks1 + 1      # stride 1
    Ho2, Wo2 = Ho1 + 2 * pad2 - ks2 + 1, Wo1 + 2 * pad2 - ks2 + 1
    Wp1, Wp2 = W + 2 * pad1, Wo1 + 2 * pad2
    F1 = (H + 2 * pad1) * Wp1 + ks1 - 1
    F2 = (Ho1 + 2 * pad2) * Wp2 + ks2 - 1
    L1, L2 = Ho1 * Wp1, Ho2 * Wp2

    # Free minor-dim reshape (no relayout, no extra HBM traffic).
    x_flat = x_nchw.reshape(N, Cin, H * W)

    kern = functools.partial(_fused_conv2_kernel, ks1=ks1, ks2=ks2,
                             wp1=Wp1, wp2=Wp2, l1=L1, l2=L2,
                             apply_relu=apply_relu)

    out_flat = pl.pallas_call(
        kern,
        out_shape=jax.ShapeDtypeStruct((N, C2, Ho2 * Wo2), x_nchw.dtype),
        grid_spec=pltpu.PrefetchScalarGridSpec(
            num_scalar_prefetch=0,
            grid=(N,),                      # one image per step; parallel for v7x's 2 TCs
            in_specs=[
                pl.BlockSpec((1, Cin, H * W), lambda n: (n, 0, 0)),
                pl.BlockSpec((ks1 * ks1, C1, Cin), lambda n: (0, 0, 0)),
                pl.BlockSpec((C1, 1), lambda n: (0, 0)),
                pl.BlockSpec((H * W, F1), lambda n: (0, 0)),
                pl.BlockSpec((ks2 * ks2, C2, C1), lambda n: (0, 0, 0)),
                pl.BlockSpec((C2, 1), lambda n: (0, 0)),
                pl.BlockSpec((L1, F2), lambda n: (0, 0)),
                pl.BlockSpec((L2, Ho2 * Wo2), lambda n: (0, 0)),
            ],
            out_specs=pl.BlockSpec((1, C2, Ho2 * Wo2), lambda n: (n, 0, 0)),
        ),
        compiler_params=pltpu.CompilerParams(dimension_semantics=("parallel",)),
    )(x_flat, w1t, b1, s0, w2t, b2, p1, p2)

    # Free minor-dim reshape to NCHW (no transpose, no relayout).
    return out_flat.reshape(N, C2, Ho2, Wo2)


class Conv2dBlockPallas:
    """Mirrors Conv2dBlock with norm='none', activation='relu', pool_type='none'."""

    def __init__(self, key, in_dim, out_dims, conv_ks_lst, conv_padding):
        assert len(out_dims) == len(conv_ks_lst) == len(conv_padding) == 2, \
            "fused kernel implements the default 2-conv stack"
        self.paddings = list(conv_padding)
        self.ks = list(conv_ks_lst)
        self.params = []
        dim_in = in_dim
        for dim, ks in zip(out_dims, conv_ks_lst):
            key, kw_key, kb_key = jax.random.split(key, 3)
            fan_in = dim_in * ks * ks
            bound = 1.0 / np.sqrt(fan_in)
            # HWIO weights, deterministic init (PyTorch-style uniform bounds).
            w = jax.random.uniform(kw_key, (ks, ks, dim_in, dim), jnp.float32, -bound, bound)
            b = jax.random.uniform(kb_key, (dim,), jnp.float32, -bound, bound)
            self.params.append((w, b))
            dim_in = dim
        self._cache = {}

    def _prepare(self, H, W):
        key = (H, W)
        if key in self._cache:
            return self._cache[key]
        ks1, ks2 = self.ks
        pad1, pad2 = self.paddings
        (w1, b1), (w2, b2) = self.params
        Cin, C1 = w1.shape[2], w1.shape[3]
        C2 = w2.shape[3]
        Ho1, Wo1 = H + 2 * pad1 - ks1 + 1, W + 2 * pad1 - ks1 + 1
        Ho2, Wo2 = Ho1 + 2 * pad2 - ks2 + 1, Wo1 + 2 * pad2 - ks2 + 1

        s0 = jnp.asarray(_pad_scatter(H, W, pad1, ks1))
        p1 = jnp.asarray(_wide_to_pad_scatter(Ho1, Wo1, W + 2 * pad1, pad2, ks2))
        p2 = jnp.asarray(_wide_to_valid(Ho2, Wo2, Wo1 + 2 * pad2))

        # Per-tap (Cout, Cin) matrices for the spatial-on-lanes formulation.
        w1t = jnp.transpose(w1, (0, 1, 3, 2)).reshape(ks1 * ks1, C1, Cin)
        w2t = jnp.transpose(w2, (0, 1, 3, 2)).reshape(ks2 * ks2, C2, C1)
        b1c = b1.reshape(C1, 1)
        b2c = b2.reshape(C2, 1)

        fwd = jax.jit(functools.partial(conv2d_block_forward,
                                        ks1=ks1, ks2=ks2, pad1=pad1, pad2=pad2))
        entry = (fwd, (w1t, b1c, s0, w2t, b2c, p1, p2))
        self._cache[key] = entry
        return entry

    def __call__(self, x_nchw):
        fwd, (w1t, b1c, s0, w2t, b2c, p1, p2) = self._prepare(x_nchw.shape[2],
                                                              x_nchw.shape[3])
        return fwd(x_nchw, w1t, b1c, w2t, b2c, s0, p1, p2)


def _reference_forward(x_nchw, params, paddings):
    """Pure-JAX reference matching PyTorch Conv2d semantics (NCHW / OIHW)."""
    x = x_nchw
    for (w_hwio, b), pad in zip(params, paddings):
        w_oihw = jnp.transpose(w_hwio, (3, 2, 0, 1))
        x = jax.lax.conv_general_dilated(
            x, w_oihw, window_strides=(1, 1),
            padding=[(pad, pad), (pad, pad)],
            dimension_numbers=("NCHW", "OIHW", "NCHW"))
        x = x + b.reshape(1, -1, 1, 1)
    return jnp.maximum(x, 0.0)


if __name__ == "__main__":
    key = jax.random.PRNGKey(0)
    key, xk = jax.random.split(key)

    N, Cin, H, W = 2, 4, 16, 16
    x = jax.random.normal(xk, (N, Cin, H, W), jnp.float32)   # NCHW, like PyTorch

    block = Conv2dBlockPallas(
        key,
        in_dim=Cin,
        out_dims=[8, 16],
        conv_ks_lst=[3, 3],
        conv_padding=[1, 1],
    )

    out = jax.block_until_ready(block(x))

    ref = jax.block_until_ready(_reference_forward(x, block.params, block.paddings))
    assert out.shape == ref.shape == (N, 16, H, W), (out.shape, ref.shape)
    np.testing.assert_allclose(np.asarray(out), np.asarray(ref), rtol=1e-5, atol=1e-5)

    print("KERNEL_OK")
</pallas_src>

<mosaic_0001>
module attributes {stable_mosaic.version = 11 : i64} {
  func.func @_fused_conv2_kernel(%arg0: i32, %arg1: memref<1x4x256xf32, #tpu.memory_space<vmem>>, %arg2: memref<9x8x4xf32, #tpu.memory_space<vmem>>, %arg3: memref<8x1xf32, #tpu.memory_space<vmem>>, %arg4: memref<256x326xf32, #tpu.memory_space<vmem>>, %arg5: memref<9x16x8xf32, #tpu.memory_space<vmem>>, %arg6: memref<16x1xf32, #tpu.memory_space<vmem>>, %arg7: memref<288x326xf32, #tpu.memory_space<vmem>>, %arg8: memref<288x256xf32, #tpu.memory_space<vmem>>, %arg9: memref<1x16x256xf32, #tpu.memory_space<vmem>>) attributes {dimension_semantics = [#tpu.dimension_semantics<parallel>], iteration_bounds = array<i64: 2>, scalar_prefetch = 0 : i64, scratch_operands = 0 : i64, tpu.core_type = #tpu.core_type<tc>, window_params = [{transform_indices = @transform_0, window_bounds = array<i64: 1, 4, 256>}, {pipeline_mode = #tpu.pipeline_mode<synchronous>, transform_indices = @transform_1, window_bounds = array<i64: 9, 8, 4>}, {pipeline_mode = #tpu.pipeline_mode<synchronous>, transform_indices = @transform_2, window_bounds = array<i64: 8, 1>}, {pipeline_mode = #tpu.pipeline_mode<synchronous>, transform_indices = @transform_3, window_bounds = array<i64: 256, 326>}, {pipeline_mode = #tpu.pipeline_mode<synchronous>, transform_indices = @transform_4, window_bounds = array<i64: 9, 16, 8>}, {pipeline_mode = #tpu.pipeline_mode<synchronous>, transform_indices = @transform_5, window_bounds = array<i64: 16, 1>}, {pipeline_mode = #tpu.pipeline_mode<synchronous>, transform_indices = @transform_6, window_bounds = array<i64: 288, 326>}, {pipeline_mode = #tpu.pipeline_mode<synchronous>, transform_indices = @transform_7, window_bounds = array<i64: 288, 256>}, {transform_indices = @transform_8, window_bounds = array<i64: 1, 16, 256>}]} {
    %c0 = arith.constant 0 : index
    %c0_0 = arith.constant 0 : index
    %c0_1 = arith.constant 0 : index
    %0 = vector.load %arg1[%c0, %c0_0, %c0_1] : memref<1x4x256xf32, #tpu.memory_space<vmem>>, vector<1x4x256xf32>
    %1 = vector.shape_cast %0 : vector<1x4x256xf32> to vector<4x256xf32>
    %c0_2 = arith.constant 0 : index
    %c0_3 = arith.constant 0 : index
    %2 = vector.load %arg4[%c0_2, %c0_3] : memref<256x326xf32, #tpu.memory_space<vmem>>, vector<256x326xf32>
    %cst = arith.constant dense<0.000000e+00> : vector<4x326xf32>
    %3 = tpu.matmul %1, %2, %cst {dimension_numbers = #tpu.dot_dimension_numbers<[1], [0], [0], [1], [0, 0, 1, 1], [], []>} : vector<4x256xf32>, vector<256x326xf32>, vector<4x326xf32> -> vector<4x326xf32>
    %cst_4 = arith.constant 0.000000e+00 : f32
    %4 = vector.broadcast %cst_4 : f32 to vector<8x288xf32>
    %c0_5 = arith.constant 0 : index
    %c0_6 = arith.constant 0 : index
    %c0_7 = arith.constant 0 : index
    %5 = vector.load %arg2[%c0_5, %c0_6, %c0_7] : memref<9x8x4xf32, #tpu.memory_space<vmem>>, vector<1x8x4xf32>
    %6 = vector.shape_cast %5 : vector<1x8x4xf32> to vector<8x4xf32>
    %7 = vector.extract_strided_slice %3 {offsets = [0, 0], sizes = [4, 288], strides = [1, 1]} : vector<4x326xf32> to vector<4x288xf32>
    %cst_8 = arith.constant dense<0.000000e+00> : vector<8x288xf32>
    %8 = tpu.matmul %6, %7, %cst_8 {dimension_numbers = #tpu.dot_dimension_numbers<[1], [0], [0], [1], [0, 0, 1, 1], [], []>} : vector<8x4xf32>, vector<4x288xf32>, vector<8x288xf32> -> vector<8x288xf32>
    %9 = arith.addf %4, %8 : vector<8x288xf32>
    %c1 = arith.constant 1 : index
    %c0_9 = arith.constant 0 : index
    %c0_10 = arith.constant 0 : index
    %10 = vector.load %arg2[%c1, %c0_9, %c0_10] : memref<9x8x4xf32, #tpu.memory_space<vmem>>, vector<1x8x4xf32>
    %11 = vector.shape_cast %10 : vector<1x8x4xf32> to vector<8x4xf32>
    %12 = vector.extract_strided_slice %3 {offsets = [0, 1], sizes = [4, 288], strides = [1, 1]} : vector<4x326xf32> to vector<4x288xf32>
    %cst_11 = arith.constant dense<0.000000e+00> : vector<8x288xf32>
    %13 = tpu.matmul %11, %12, %cst_11 {dimension_numbers = #tpu.dot_dimension_numbers<[1], [0], [0], [1], [0, 0, 1, 1], [], []>} : vector<8x4xf32>, vector<4x288xf32>, vector<8x288xf32> -> vector<8x288xf32>
    %14 = arith.addf %9, %13 : vector<8x288xf32>
    %c2 = arith.constant 2 : index
    %c0_12 = arith.constant 0 : index
    %c0_13 = arith.constant 0 : index
    %15 = vector.load %arg2[%c2, %c0_12, %c0_13] : memref<9x8x4xf32, #tpu.memory_space<vmem>>, vector<1x8x4xf32>
    %16 = vector.shape_cast %15 : vector<1x8x4xf32> to vector<8x4xf32>
    %17 = vector.extract_strided_slice %3 {offsets = [0, 2], sizes = [4, 288], strides = [1, 1]} : vector<4x326xf32> to vector<4x288xf32>
    %cst_14 = arith.constant dense<0.000000e+00> : vector<8x288xf32>
    %18 = tpu.matmul %16, %17, %cst_14 {dimension_numbers = #tpu.dot_dimension_numbers<[1], [0], [0], [1], [0, 0, 1, 1], [], []>} : vector<8x4xf32>, vector<4x288xf32>, vector<8x288xf32> -> vector<8x288xf32>
    %19 = arith.addf %14, %18 : vector<8x288xf32>
    %c3 = arith.constant 3 : index
    %c0_15 = arith.constant 0 : index
    %c0_16 = arith.constant 0 : index
    %20 = vector.load %arg2[%c3, %c0_15, %c0_16] : memref<9x8x4xf32, #tpu.memory_space<vmem>>, vector<1x8x4xf32>
    %21 = vector.shape_cast %20 : vector<1x8x4xf32> to vector<8x4xf32>
    %22 = vector.extract_strided_slice %3 {offsets = [0, 18], sizes = [4, 288], strides = [1, 1]} : vector<4x326xf32> to vector<4x288xf32>
    %cst_17 = arith.constant dense<0.000000e+00> : vector<8x288xf32>
    %23 = tpu.matmul %21, %22, %cst_17 {dimension_numbers = #tpu.dot_dimension_numbers<[1], [0], [0], [1], [0, 0, 1, 1], [], []>} : vector<8x4xf32>, vector<4x288xf32>, vector<8x288xf32> -> vector<8x288xf32>
    %24 = arith.addf %19, %23 : vector<8x288xf32>
    %c4 = arith.constant 4 : index
    %c0_18 = arith.constant 0 : index
    %c0_19 = arith.constant 0 : index
    %25 = vector.load %arg2[%c4, %c0_18, %c0_19] : memref<9x8x4xf32, #tpu.memory_space<vmem>>, vector<1x8x4xf32>
    %26 = vector.shape_cast %25 : vector<1x8x4xf32> to vector<8x4xf32>
    %27 = vector.extract_strided_slice %3 {offsets = [0, 19], sizes = [4, 288], strides = [1, 1]} : vector<4x326xf32> to vector<4x288xf32>
    %cst_20 = arith.constant dense<0.000000e+00> : vector<8x288xf32>
    %28 = tpu.matmul %26, %27, %cst_20 {dimension_numbers = #tpu.dot_dimension_numbers<[1], [0], [0], [1], [0, 0, 1, 1], [], []>} : vector<8x4xf32>, vector<4x288xf32>, vector<8x288xf32> -> vector<8x288xf32>
    %29 = arith.addf %24, %28 : vector<8x288xf32>
    %c5 = arith.constant 5 : index
    %c0_21 = arith.constant 0 : index
    %c0_22 = arith.constant 0 : index
    %30 = vector.load %arg2[%c5, %c0_21, %c0_22] : memref<9x8x4xf32, #tpu.memory_space<vmem>>, vector<1x8x4xf32>
    %31 = vector.shape_cast %30 : vector<1x8x4xf32> to vector<8x4xf32>
    %32 = vector.extract_strided_slice %3 {offsets = [0, 20], sizes = [4, 288], strides = [1, 1]} : vector<4x326xf32> to vector<4x288xf32>
    %cst_23 = arith.constant dense<0.000000e+00> : vector<8x288xf32>
    %33 = tpu.matmul %31, %32, %cst_23 {dimension_numbers = #tpu.dot_dimension_numbers<[1], [0], [0], [1], [0, 0, 1, 1], [], []>} : vector<8x4xf32>, vector<4x288xf32>, vector<8x288xf32> -> vector<8x288xf32>
    %34 = arith.addf %29, %33 : vector<8x288xf32>
    %c6 = arith.constant 6 : index
    %c0_24 = arith.constant 0 : index
    %c0_25 = arith.constant 0 : index
    %35 = vector.load %arg2[%c6, %c0_24, %c0_25] : memref<9x8x4xf32, #tpu.memory_space<vmem>>, vector<1x8x4xf32>
    %36 = vector.shape_cast %35 : vector<1x8x4xf32> to vector<8x4xf32>
    %37 = vector.extract_strided_slice %3 {offsets = [0, 36], sizes = [4, 288], strides = [1, 1]} : vector<4x326xf32> to vector<4x288xf32>
    %cst_26 = arith.constant dense<0.000000e+00> : vector<8x288xf32>
    %38 = tpu.matmul %36, %37, %cst_26 {dimension_numbers = #tpu.dot_dimension_numbers<[1], [0], [0], [1], [0, 0, 1, 1], [], []>} : vector<8x4xf32>, vector<4x288xf32>, vector<8x288xf32> -> vector<8x288xf32>
    %39 = arith.addf %34, %38 : vector<8x288xf32>
    %c7 = arith.constant 7 : index
    %c0_27 = arith.constant 0 : index
    %c0_28 = arith.constant 0 : index
    %40 = vector.load %arg2[%c7, %c0_27, %c0_28] : memref<9x8x4xf32, #tpu.memory_space<vmem>>, vector<1x8x4xf32>
    %41 = vector.shape_cast %40 : vector<1x8x4xf32> to vector<8x4xf32>
    %42 = vector.extract_strided_slice %3 {offsets = [0, 37], sizes = [4, 288], strides = [1, 1]} : vector<4x326xf32> to vector<4x288xf32>
    %cst_29 = arith.constant dense<0.000000e+00> : vector<8x288xf32>
    %43 = tpu.matmul %41, %42, %cst_29 {dimension_numbers = #tpu.dot_dimension_numbers<[1], [0], [0], [1], [0, 0, 1, 1], [], []>} : vector<8x4xf32>, vector<4x288xf32>, vector<8x288xf32> -> vector<8x288xf32>
    %44 = arith.addf %39, %43 : vector<8x288xf32>
    %c8 = arith.constant 8 : index
    %c0_30 = arith.constant 0 : index
    %c0_31 = arith.constant 0 : index
    %45 = vector.load %arg2[%c8, %c0_30, %c0_31] : memref<9x8x4xf32, #tpu.memory_space<vmem>>, vector<1x8x4xf32>
    %46 = vector.shape_cast %45 : vector<1x8x4xf32> to vector<8x4xf32>
    %47 = vector.extract_strided_slice %3 {offsets = [0, 38], sizes = [4, 288], strides = [1, 1]} : vector<4x326xf32> to vector<4x288xf32>
    %cst_32 = arith.constant dense<0.000000e+00> : vector<8x288xf32>
    %48 = tpu.matmul %46, %47, %cst_32 {dimension_numbers = #tpu.dot_dimension_numbers<[1], [0], [0], [1], [0, 0, 1, 1], [], []>} : vector<8x4xf32>, vector<4x288xf32>, vector<8x288xf32> -> vector<8x288xf32>
    %49 = arith.addf %44, %48 : vector<8x288xf32>
    %c0_33 = arith.constant 0 : index
    %c0_34 = arith.constant 0 : index
    %50 = vector.load %arg3[%c0_33, %c0_34] : memref<8x1xf32, #tpu.memory_space<vmem>>, vector<8x1xf32>
    %51 = vector.broadcast %50 : vector<8x1xf32> to vector<8x288xf32>
    %52 = arith.addf %49, %51 : vector<8x288xf32>
    %c0_35 = arith.constant 0 : index
    %c0_36 = arith.constant 0 : index
    %53 = vector.load %arg7[%c0_35, %c0_36] : memref<288x326xf32, #tpu.memory_space<vmem>>, vector<288x326xf32>
    %cst_37 = arith.constant dense<0.000000e+00> : vector<8x326xf32>
    %54 = tpu.matmul %52, %53, %cst_37 {dimension_numbers = #tpu.dot_dimension_numbers<[1], [0], [0], [1], [0, 0, 1, 1], [], []>} : vector<8x288xf32>, vector<288x326xf32>, vector<8x326xf32> -> vector<8x326xf32>
    %cst_38 = arith.constant 0.000000e+00 : f32
    %55 = vector.broadcast %cst_38 : f32 to vector<16x288xf32>
    %c0_39 = arith.constant 0 : index
    %c0_40 = arith.constant 0 : index
    %c0_41 = arith.constant 0 : index
    %56 = vector.load %arg5[%c0_39, %c0_40, %c0_41] : memref<9x16x8xf32, #tpu.memory_space<vmem>>, vector<1x16x8xf32>
    %57 = vector.shape_cast %56 : vector<1x16x8xf32> to vector<16x8xf32>
    %58 = vector.extract_strided_slice %54 {offsets = [0, 0], sizes = [8, 288], strides = [1, 1]} : vector<8x326xf32> to vector<8x288xf32>
    %cst_42 = arith.constant dense<0.000000e+00> : vector<16x288xf32>
    %59 = tpu.matmul %57, %58, %cst_42 {dimension_numbers = #tpu.dot_dimension_numbers<[1], [0], [0], [1], [0, 0, 1, 1], [], []>} : vector<16x8xf32>, vector<8x288xf32>, vector<16x288xf32> -> vector<16x288xf32>
    %60 = arith.addf %55, %59 : vector<16x288xf32>
    %c1_43 = arith.constant 1 : index
    %c0_44 = arith.constant 0 : index
    %c0_45 = arith.constant 0 : index
    %61 = vector.load %arg5[%c1_43, %c0_44, %c0_45] : memref<9x16x8xf32, #tpu.memory_space<vmem>>, vector<1x16x8xf32>
    %62 = vector.shape_cast %61 : vector<1x16x8xf32> to vector<16x8xf32>
    %63 = vector.extract_strided_slice %54 {offsets = [0, 1], sizes = [8, 288], strides = [1, 1]} : vector<8x326xf32> to vector<8x288xf32>
    %cst_46 = arith.constant dense<0.000000e+00> : vector<16x288xf32>
    %64 = tpu.matmul %62, %63, %cst_46 {dimension_numbers = #tpu.dot_dimension_numbers<[1], [0], [0], [1], [0, 0, 1, 1], [], []>} : vector<16x8xf32>, vector<8x288xf32>, vector<16x288xf32> -> vector<16x288xf32>
    %65 = arith.addf %60, %64 : vector<16x288xf32>
    %c2_47 = arith.constant 2 : index
    %c0_48 = arith.constant 0 : index
    %c0_49 = arith.constant 0 : index
    %66 = vector.load %arg5[%c2_47, %c0_48, %c0_49] : memref<9x16x8xf32, #tpu.memory_space<vmem>>, vector<1x16x8xf32>
    %67 = vector.shape_cast %66 : vector<1x16x8xf32> to vector<16x8xf32>
    %68 = vector.extract_strided_slice %54 {offsets = [0, 2], sizes = [8, 288], strides = [1, 1]} : vector<8x326xf32> to vector<8x288xf32>
    %cst_50 = arith.constant dense<0.000000e+00> : vector<16x288xf32>
    %69 = tpu.matmul %67, %68, %cst_50 {dimension_numbers = #tpu.dot_dimension_numbers<[1], [0], [0], [1], [0, 0, 1, 1], [], []>} : vector<16x8xf32>, vector<8x288xf32>, vector<16x288xf32> -> vector<16x288xf32>
    %70 = arith.addf %65, %69 : vector<16x288xf32>
    %c3_51 = arith.constant 3 : index
    %c0_52 = arith.constant 0 : index
    %c0_53 = arith.constant 0 : index
    %71 = vector.load %arg5[%c3_51, %c0_52, %c0_53] : memref<9x16x8xf32, #tpu.memory_space<vmem>>, vector<1x16x8xf32>
    %72 = vector.shape_cast %71 : vector<1x16x8xf32> to vector<16x8xf32>
    %73 = vector.extract_strided_slice %54 {offsets = [0, 18], sizes = [8, 288], strides = [1, 1]} : vector<8x326xf32> to vector<8x288xf32>
    %cst_54 = arith.constant dense<0.000000e+00> : vector<16x288xf32>
    %74 = tpu.matmul %72, %73, %cst_54 {dimension_numbers = #tpu.dot_dimension_numbers<[1], [0], [0], [1], [0, 0, 1, 1], [], []>} : vector<16x8xf32>, vector<8x288xf32>, vector<16x288xf32> -> vector<16x288xf32>
    %75 = arith.addf %70, %74 : vector<16x288xf32>
    %c4_55 = arith.constant 4 : index
    %c0_56 = arith.constant 0 : index
    %c0_57 = arith.constant 0 : index
    %76 = vector.load %arg5[%c4_55, %c0_56, %c0_57] : memref<9x16x8xf32, #tpu.memory_space<vmem>>, vector<1x16x8xf32>
    %77 = vector.shape_cast %76 : vector<1x16x8xf32> to vector<16x8xf32>
    %78 = vector.extract_strided_slice %54 {offsets = [0, 19], sizes = [8, 288], strides = [1, 1]} : vector<8x326xf32> to vector<8x288xf32>
    %cst_58 = arith.constant dense<0.000000e+00> : vector<16x288xf32>
    %79 = tpu.matmul %77, %78, %cst_58 {dimension_numbers = #tpu.dot_dimension_numbers<[1], [0], [0], [1], [0, 0, 1, 1], [], []>} : vector<16x8xf32>, vector<8x288xf32>, vector<16x288xf32> -> vector<16x288xf32>
    %80 = arith.addf %75, %79 : vector<16x288xf32>
    %c5_59 = arith.constant 5 : index
    %c0_60 = arith.constant 0 : index
    %c0_61 = arith.constant 0 : index
    %81 = vector.load %arg5[%c5_59, %c0_60, %c0_61] : memref<9x16x8xf32, #tpu.memory_space<vmem>>, vector<1x16x8xf32>
    %82 = vector.shape_cast %81 : vector<1x16x8xf32> to vector<16x8xf32>
    %83 = vector.extract_strided_slice %54 {offsets = [0, 20], sizes = [8, 288], strides = [1, 1]} : vector<8x326xf32> to vector<8x288xf32>
    %cst_62 = arith.constant dense<0.000000e+00> : vector<16x288xf32>
    %84 = tpu.matmul %82, %83, %cst_62 {dimension_numbers = #tpu.dot_dimension_numbers<[1], [0], [0], [1], [0, 0, 1, 1], [], []>} : vector<16x8xf32>, vector<8x288xf32>, vector<16x288xf32> -> vector<16x288xf32>
    %85 = arith.addf %80, %84 : vector<16x288xf32>
    %c6_63 = arith.constant 6 : index
    %c0_64 = arith.constant 0 : index
    %c0_65 = arith.constant 0 : index
    %86 = vector.load %arg5[%c6_63, %c0_64, %c0_65] : memref<9x16x8xf32, #tpu.memory_space<vmem>>, vector<1x16x8xf32>
    %87 = vector.shape_cast %86 : vector<1x16x8xf32> to vector<16x8xf32>
    %88 = vector.extract_strided_slice %54 {offsets = [0, 36], sizes = [8, 288], strides = [1, 1]} : vector<8x326xf32> to vector<8x288xf32>
    %cst_66 = arith.constant dense<0.000000e+00> : vector<16x288xf32>
    %89 = tpu.matmul %87, %88, %cst_66 {dimension_numbers = #tpu.dot_dimension_numbers<[1], [0], [0], [1], [0, 0, 1, 1], [], []>} : vector<16x8xf32>, vector<8x288xf32>, vector<16x288xf32> -> vector<16x288xf32>
    %90 = arith.addf %85, %89 : vector<16x288xf32>
    %c7_67 = arith.constant 7 : index
    %c0_68 = arith.constant 0 : index
    %c0_69 = arith.constant 0 : index
    %91 = vector.load %arg5[%c7_67, %c0_68, %c0_69] : memref<9x16x8xf32, #tpu.memory_space<vmem>>, vector<1x16x8xf32>
    %92 = vector.shape_cast %91 : vector<1x16x8xf32> to vector<16x8xf32>
    %93 = vector.extract_strided_slice %54 {offsets = [0, 37], sizes = [8, 288], strides = [1, 1]} : vector<8x326xf32> to vector<8x288xf32>
    %cst_70 = arith.constant dense<0.000000e+00> : vector<16x288xf32>
    %94 = tpu.matmul %92, %93, %cst_70 {dimension_numbers = #tpu.dot_dimension_numbers<[1], [0], [0], [1], [0, 0, 1, 1], [], []>} : vector<16x8xf32>, vector<8x288xf32>, vector<16x288xf32> -> vector<16x288xf32>
    %95 = arith.addf %90, %94 : vector<16x288xf32>
    %c8_71 = arith.constant 8 : index
    %c0_72 = arith.constant 0 : index
    %c0_73 = arith.constant 0 : index
    %96 = vector.load %arg5[%c8_71, %c0_72, %c0_73] : memref<9x16x8xf32, #tpu.memory_space<vmem>>, vector<1x16x8xf32>
    %97 = vector.shape_cast %96 : vector<1x16x8xf32> to vector<16x8xf32>
    %98 = vector.extract_strided_slice %54 {offsets = [0, 38], sizes = [8, 288], strides = [1, 1]} : vector<8x326xf32> to vector<8x288xf32>
    %cst_74 = arith.constant dense<0.000000e+00> : vector<16x288xf32>
    %99 = tpu.matmul %97, %98, %cst_74 {dimension_numbers = #tpu.dot_dimension_numbers<[1], [0], [0], [1], [0, 0, 1, 1], [], []>} : vector<16x8xf32>, vector<8x288xf32>, vector<16x288xf32> -> vector<16x288xf32>
    %100 = arith.addf %95, %99 : vector<16x288xf32>
    %c0_75 = arith.constant 0 : index
    %c0_76 = arith.constant 0 : index
    %101 = vector.load %arg8[%c0_75, %c0_76] : memref<288x256xf32, #tpu.memory_space<vmem>>, vector<288x256xf32>
    %cst_77 = arith.constant dense<0.000000e+00> : vector<16x256xf32>
    %102 = tpu.matmul %100, %101, %cst_77 {dimension_numbers = #tpu.dot_dimension_numbers<[1], [0], [0], [1], [0, 0, 1, 1], [], []>} : vector<16x288xf32>, vector<288x256xf32>, vector<16x256xf32> -> vector<16x256xf32>
    %c0_78 = arith.constant 0 : index
    %c0_79 = arith.constant 0 : index
    %103 = vector.load %arg6[%c0_78, %c0_79] : memref<16x1xf32, #tpu.memory_space<vmem>>, vector<16x1xf32>
    %104 = vector.broadcast %103 : vector<16x1xf32> to vector<16x256xf32>
    %105 = arith.addf %102, %104 : vector<16x256xf32>
    %cst_80 = arith.constant 0.000000e+00 : f32
    %106 = vector.broadcast %cst_80 : f32 to vector<16x256xf32>
    %107 = arith.maximumf %105, %106 : vector<16x256xf32>
    %108 = vector.shape_cast %107 : vector<16x256xf32> to vector<1x16x256xf32>
    %c0_81 = arith.constant 0 : index
    %c0_82 = arith.constant 0 : index
    %c0_83 = arith.constant 0 : index
    %109 = vector.load %arg9[%c0_81, %c0_82, %c0_83] : memref<1x16x256xf32, #tpu.memory_space<vmem>>, vector<1x16x256xf32>
    tpu.vector_store %arg9[%c0_81, %c0_82, %c0_83], %108 {strides = array<i32>} : memref<1x16x256xf32, #tpu.memory_space<vmem>>, vector<1x16x256xf32>,
    return
  }
  func.func @transform_0(%arg0: i32) -> (i32, i32, i32) {
    %c0_i32 = arith.constant 0 : i32
    %c0_i32_0 = arith.constant 0 : i32
    %c0_i32_1 = arith.constant 0 : i32
    return %arg0, %c0_i32, %c0_i32_0 : i32, i32, i32
  }
  func.func @transform_1(%arg0: i32) -> (i32, i32, i32) {
    %c0_i32 = arith.constant 0 : i32
    %c0_i32_0 = arith.constant 0 : i32
    %c0_i32_1 = arith.constant 0 : i32
    %c0_i32_2 = arith.constant 0 : i32
    return %c0_i32, %c0_i32_0, %c0_i32_1 : i32, i32, i32
  }
  func.func @transform_2(%arg0: i32) -> (i32, i32) {
    %c0_i32 = arith.constant 0 : i32
    %c0_i32_0 = arith.constant 0 : i32
    %c0_i32_1 = arith.constant 0 : i32
    return %c0_i32, %c0_i32_0 : i32, i32
  }
  func.func @transform_3(%arg0: i32) -> (i32, i32) {
    %c0_i32 = arith.constant 0 : i32
    %c0_i32_0 = arith.constant 0 : i32
    %c0_i32_1 = arith.constant 0 : i32
    return %c0_i32, %c0_i32_0 : i32, i32
  }
  func.func @transform_4(%arg0: i32) -> (i32, i32, i32) {
    %c0_i32 = arith.constant 0 : i32
    %c0_i32_0 = arith.constant 0 : i32
    %c0_i32_1 = arith.constant 0 : i32
    %c0_i32_2 = arith.constant 0 : i32
    return %c0_i32, %c0_i32_0, %c0_i32_1 : i32, i32, i32
  }
  func.func @transform_5(%arg0: i32) -> (i32, i32) {
    %c0_i32 = arith.constant 0 : i32
    %c0_i32_0 = arith.constant 0 : i32
    %c0_i32_1 = arith.constant 0 : i32
    return %c0_i32, %c0_i32_0 : i32, i32
  }
  func.func @transform_6(%arg0: i32) -> (i32, i32) {
    %c0_i32 = arith.constant 0 : i32
    %c0_i32_0 = arith.constant 0 : i32
    %c0_i32_1 = arith.constant 0 : i32
    return %c0_i32, %c0_i32_0 : i32, i32
  }
  func.func @transform_7(%arg0: i32) -> (i32, i32) {
    %c0_i32 = arith.constant 0 : i32
    %c0_i32_0 = arith.constant 0 : i32
    %c0_i32_1 = arith.constant 0 : i32
    return %c0_i32, %c0_i32_0 : i32, i32
  }
  func.func @transform_8(%arg0: i32) -> (i32, i32, i32) {
    %c0_i32 = arith.constant 0 : i32
    %c0_i32_0 = arith.constant 0 : i32
    %c0_i32_1 = arith.constant 0 : i32
    return %arg0, %c0_i32, %c0_i32_0 : i32, i32, i32
  }
}

</mosaic_0001>

<bundles_post_ra>
// kernel: conv2d_block_forward.1
= control target key start
LH: loop header
LB: loop body
LE: loop exit
PB: predicated region body
PF: predicated region fallthrough
CT: control target
= control target key end

     0   :  { %s4733_s27 = smov 0   ;;  %s6017_s0 = inlined_call_operand.vmem [shape: f32[2,4,256], index: 0, kind: input, shape index: {}]   ;;  %s6018_s1 = inlined_call_operand.vmem [shape: f32[9,8,4], index: 1, kind: input, shape index: {}]   ;;  %s6019_s2 = inlined_call_operand.vmem [shape: f32[8,1], index: 2, kind: input, shape index: {}]   ;;  %s6020_s3 = inlined_call_operand.vmem [shape: f32[256,326], index: 3, kind: input, shape index: {}]   ;;  %s6021_s4 = inlined_call_operand.vmem [shape: f32[9,16,8], index: 4, kind: input, shape index: {}]   ;;  %s6022_s5 = inlined_call_operand.vmem [shape: f32[16,1], index: 5, kind: input, shape index: {}]   ;;  %s6023_s6 = inlined_call_operand.vmem [shape: f32[288,326], index: 6, kind: input, shape index: {}]   ;;  %s6024_s7 = inlined_call_operand.vmem [shape: f32[288,256], index: 7, kind: input, shape index: {}]   ;;  %s6025_s8 = inlined_call_operand.vmem [shape: f32[2,16,256], index: 8, kind: output, shape index: {}]  }
   0x1 LB: > { %s4304_s28 = sadd.s32 4294967295, %s4675_s27   ;;  %p4308_p0 = scmp.ge.s32.totalorder %s4675_s27, 1  ;;  %s4675_s27 = sphi %s4733_s27, %s18_s27  }
   0x2   : > { %p262_p1 = scmp.lt.s32.totalorder %s4675_s27, 3 }
   0x4   : > { %p263_p2 = pnand %p4308_p0, %p262_p1 }
   0x5   : > { %p4860_p3 = scmp.lt.s32.totalorder (!%p263_p2), %s4304_s28, 1  ;;  %s4678_s24 = smov (!%p263_p2), 127  }
   0x6   : > { %266 = sbr.rel (%p263_p2) target bundleno = 1477 (0x5c5), region = 52  ;;  %s4679_s26 = smov (!%p263_p2), 126  }
   0x7   : > { %s4680_s29 = smov (!%p263_p2), 110   ;;  %s4681_s30 = smov (!%p263_p2), 109  }
   0x8   : > { %s4682_s25 = smov (!%p263_p2), 92   ;;  %s4683_s9 = smov (!%p263_p2), 108  }
   0x9   : > { %s4684_s10 = smov (!%p263_p2), 90   ;;  %s4685_s11 = smov (!%p263_p2), 91  }
   0xb   : > { %v353_v0 = vld [vmem:[%s6020_s3 + $0x170] sm:$0xff]  ;;  %v352_v1 = vld [vmem:[%s6020_s3 + $0x168] sm:$0xff]  ;;  %v350_v2 = vld [vmem:[%s6020_s3 + $0x158] sm:$0xff]  ;;  %s6028_s28 = smov (!%p4860_p3, %s4304_s28), 1  ;;  %vm559_vm0 = vcmask 1039360   ;;  %vm566_vm1 = vcmask 1043456  }
   0xc   : > { %406 = vmatprep.subr.mxu0 %v353_v0  ;;  %v349_v3 = vld [vmem:[%s6020_s3 + $0x150] sm:$0xff]  ;;  %v347_v4 = vld [vmem:[%s6020_s3 + $0x140] sm:$0xff]  ;;  %v346_v5 = vld [vmem:[%s6020_s3 + $0x138] sm:$0xff]  ;;  %s4424_s18 = sshll.u32 %s6028_s28, 3  ;;  %vm562_vm2 = vcmask 31744   ;;  %vm4687_vm3 = vmmov 0  }
   0xd   : > { %407 = vmatpush1.msra.mxu0 %v352_v1  ;;  %v344_v6 = vld [vmem:[%s6020_s3 + $0x128] sm:$0xff]  ;;  %v343_v7 = vld [vmem:[%s6020_s3 + $0x120] sm:$0xff]  ;;  %v341_v8 = vld [vmem:[%s6020_s3 + $0x110] sm:$0xff]  ;;  %s300_s13 = scalar_lea.vmem %s6017_s0, %s4424_s18  ;;  %vm872_vm4 = vcmask 1031168   ;;  %vm1036_vm5 = vcmask 900096   ;;  %vm1364_vm6 = vcmask 883712  }
   0xe   : > { %408 = vmatprep.subr.mxu0 %v350_v2  ;;  %v340_v9 = vld [vmem:[%s6020_s3 + $0x108] sm:$0xff]  ;;  %v338_v10 = vld [vmem:[%s6020_s3 + $0xf8] sm:$0xff]  ;;  %v337_v11 = vld [vmem:[%s6020_s3 + $0xf0] sm:$0xff]  ;;  %vm1200_vm7 = vcmask 891904   ;;  %vm1528_vm8 = vcmask 752640   ;;  %vm1692_vm9 = vcmask 744448  }
   0xf   : > { %409 = vmatpush1.msra.mxu0 %v349_v3  ;;  %v335_v12 = vld [vmem:[%s6020_s3 + $0xe0] sm:$0xff]  ;;  %v334_v13 = vld [vmem:[%s6020_s3 + $0xd8] sm:$0xff]  ;;  %v332_v16 = vld [vmem:[%s6020_s3 + $0xc8] sm:$0xff]  ;;  %vm1856_vm10 = vcmask 736256   ;;  %vm2129_vm11 = vcmask 261120   ;;  %vm2434_vm12 = vcmask 64512  }
  0x10   : > { %410 = vmatprep.subr.mxu0 %v347_v4  ;;  %v402_v14 = vld [vmem:[%s6020_s3 + $0x2f8] sm:$0xff]  ;;  %v399_v17 = vld [vmem:[%s6020_s3 + $0x2e0] sm:$0xff]  ;;  %v396_v20 = vld [vmem:[%s6020_s3 + $0x2c8] sm:$0xff]  ;;  %s4425_s12 = sshll.u32 %s6028_s28, 5 }
  0x11   : > { %411 = vmatpush1.msra.mxu0 %v346_v5  ;;  %v354_v15 = vld [vmem:[%s6020_s3 + $0x178] sm:$0xff]  ;;  %4426 = vmatprep.subr.mxu1 %v402_v14  ;;  %v331_v18 = vld [vmem:[%s6020_s3 + $0xc0] sm:$0xff]  ;;  %v329_v21 = vld [vmem:[%s6020_s3 + $0xb0] sm:$0xff] }
  0x12   : > { %412 = vmatprep.subr.mxu0 %v344_v6  ;;  %4427 = vmatpush3.msra.mxu1 %v354_v15  ;;  %v351_v19 = vld [vmem:[%s6020_s3 + $0x160] sm:$0xff]  ;;  %v348_v22 = vld [vmem:[%s6020_s3 + $0x148] sm:$0xff]  ;;  %v393_v24 = vld [vmem:[%s6020_s3 + $0x2b0] sm:$0xff] }
  0x13   : > { %413 = vmatpush1.msra.mxu0 %v343_v7  ;;  %4428 = vmatprep.subr.mxu1 %v399_v17  ;;  %v328_v23 = vld [vmem:[%s6020_s3 + $0xa8] sm:$0xff]  ;;  %v326_v25 = vld [vmem:[%s6020_s3 + $0x98] sm:$0xff]  ;;  %v345_v26 = vld [vmem:[%s6020_s3 + $0x130] sm:$0xff] }
  0x14   : > { %414 = vmatprep.subr.mxu0 %v341_v8  ;;  %4429 = vmatpush3.msra.mxu1 %v351_v19  ;;  %v325_v27 = vld [vmem:[%s6020_s3 + $0x90] sm:$0xff]  ;;  %v390_v28 = vld [vmem:[%s6020_s3 + $0x298] sm:$0xff]  ;;  %v323_v29 = vld [vmem:[%s6020_s3 + $0x80] sm:$0xff] }
  0x15   : > { %415 = vmatpush1.msra.mxu0 %v340_v9  ;;  %4430 = vmatprep.subr.mxu1 %v396_v20  ;;  %v342_v30 = vld [vmem:[%s6020_s3 + $0x118] sm:$0xff]  ;;  %v387_v32 = vld [vmem:[%s6020_s3 + $0x280] sm:$0xff]  ;;  %v320_v33 = vld [vmem:[%s6020_s3 + $0x68] sm:$0xff] }
  0x16   : > { %416 = vmatprep.subr.mxu0 %v338_v10  ;;  %4431 = vmatpush3.msra.mxu1 %v348_v22  ;;  %v322_v31 = vld [vmem:[%s6020_s3 + $0x78] sm:$0xff]  ;;  %v339_v34 = vld [vmem:[%s6020_s3 + $0x100] sm:$0xff]  ;;  %v384_v36 = vld [vmem:[%s6020_s3 + $0x268] sm:$0xff] }
  0x17   : > { %417 = vmatpush1.msra.mxu0 %v337_v11  ;;  %4432 = vmatprep.subr.mxu1 %v393_v24  ;;  %v319_v35 = vld [vmem:[%s6020_s3 + $0x60] sm:$0xff]  ;;  %v317_v37 = vld [vmem:[%s6020_s3 + $0x50] sm:$0xff]  ;;  %v336_v38 = vld [vmem:[%s6020_s3 + $0xe8] sm:$0xff] }
  0x18   : > { %418 = vmatprep.subr.mxu0 %v335_v12  ;;  %4433 = vmatpush3.msra.mxu1 %v345_v26  ;;  %v316_v39 = vld [vmem:[%s6020_s3 + $0x48] sm:$0xff]  ;;  %v381_v40 = vld [vmem:[%s6020_s3 + $0x250] sm:$0xff]  ;;  %v314_v41 = vld [vmem:[%s6020_s3 + $0x38] sm:$0xff] }
  0x19   : > { %419 = vmatpush1.msra.mxu0 %v334_v13  ;;  %4434 = vmatprep.subr.mxu1 %v390_v28  ;;  %v333_v42 = vld [vmem:[%s6020_s3 + $0xd0] sm:$0xff]  ;;  %v378_v44 = vld [vmem:[%s6020_s3 + $0x238] sm:$0xff]  ;;  %v311_v45 = vld [vmem:[%s6020_s3 + $0x20] sm:$0xff] }
  0x1a   : > { %420 = vmatprep.subr.mxu0 %v332_v16  ;;  %4435 = vmatpush3.msra.mxu1 %v342_v30  ;;  %v313_v43 = vld [vmem:[%s6020_s3 + $0x30] sm:$0xff]  ;;  %v330_v46 = vld [vmem:[%s6020_s3 + $0xb8] sm:$0xff]  ;;  %v375_v48 = vld [vmem:[%s6020_s3 + $0x220] sm:$0xff] }
  0x1b   : > { %421 = vmatpush1.msra.mxu0 %v331_v18  ;;  %4436 = vmatprep.subr.mxu1 %v387_v32  ;;  %v310_v47 = vld [vmem:[%s6020_s3 + $0x18] sm:$0xff]  ;;  %v308_v49 = vld [vmem:[%s6020_s3 + $0x8] sm:$0xff]  ;;  %v327_v50 = vld [vmem:[%s6020_s3 + $0xa0] sm:$0xff] }
  0x1c   : > { %422 = vmatprep.subr.mxu0 %v329_v21  ;;  %4437 = vmatpush3.msra.mxu1 %v339_v34  ;;  %v307_v51 = vld [vmem:[%s6020_s3] sm:$0xff]  ;;  %v372_v52 = vld [vmem:[%s6020_s3 + $0x208] sm:$0xff]  ;;  %v401_v53 = vld [vmem:[%s6020_s3 + $0x2f0] sm:$0xff]  ;;  %v4677_v34 = vmov 0.0  }
  0x1d   : > { %423 = vmatpush1.msra.mxu0 %v328_v23  ;;  %4438 = vmatprep.subr.mxu1 %v384_v36  ;;  %v324_v54 = vld [vmem:[%s6020_s3 + $0x88] sm:$0xff]  ;;  %v369_v56 = vld [vmem:[%s6020_s3 + $0x1f0] sm:$0xff]  ;;  %v398_v57 = vld [vmem:[%s6020_s3 + $0x2d8] sm:$0xff] }
  0x1e   : > { %424 = vmatprep.subr.mxu0 %v326_v25  ;;  %4439 = vmatpush3.msra.mxu1 %v336_v38  ;;  %v400_v55 = vld [vmem:[%s6020_s3 + $0x2e8] sm:$0xff]  ;;  %v321_v58 = vld [vmem:[%s6020_s3 + $0x70] sm:$0xff]  ;;  %v366_v60 = vld [vmem:[%s6020_s3 + $0x1d8] sm:$0xff] }
  0x1f   : > { %425 = vmatpush1.msra.mxu0 %v325_v27  ;;  %4440 = vmatprep.subr.mxu1 %v381_v40  ;;  %v397_v59 = vld [vmem:[%s6020_s3 + $0x2d0] sm:$0xff]  ;;  %v395_v61 = vld [vmem:[%s6020_s3 + $0x2c0] sm:$0xff]  ;;  %v318_v62 = vld [vmem:[%s6020_s3 + $0x58] sm:$0xff] }
  0x20   : > { %426 = vmatprep.subr.mxu0 %v323_v29  ;;  %4441 = vmatpush3.msra.mxu1 %v333_v42  ;;  %v394_v63 = vld [vmem:[%s6020_s3 + $0x2b8] sm:$0xff]  ;;  %v363_v0 = vld [vmem:[%s6020_s3 + $0x1c0] sm:$0xff]  ;;  %v392_v1 = vld [vmem:[%s6020_s3 + $0x2a8] sm:$0xff] }
  0x21   : > { %427 = vmatpush1.msra.mxu0 %v322_v31  ;;  %4442 = vmatprep.subr.mxu1 %v378_v44  ;;  %v315_v2 = vld [vmem:[%s6020_s3 + $0x40] sm:$0xff]  ;;  %v360_v5 = vld [vmem:[%s6020_s3 + $0x1a8] sm:$0xff]  ;;  %v389_v6 = vld [vmem:[%s6020_s3 + $0x290] sm:$0xff] }
  0x22   : > { %428 = vmatprep.subr.mxu0 %v320_v33  ;;  %4443 = vmatpush3.msra.mxu1 %v330_v46  ;;  %v4958_v3 = vld [vmem:[%s300_s13] sm:$0xff]  ;;  %v312_v7 = vld [vmem:[%s6020_s3 + $0x28] sm:$0xff]  ;;  %v357_v9 = vld [vmem:[%s6020_s3 + $0x190] sm:$0xff] }
  0x23   : > { %429 = vmatpush1.msra.mxu0 %v319_v35  ;;  %4444 = vmatprep.subr.mxu1 %v375_v48  ;;  %v391_v4 = vld [vmem:[%s6020_s3 + $0x2a0] sm:$0xff]  ;;  %v388_v8 = vld [vmem:[%s6020_s3 + $0x288] sm:$0xff]  ;;  %v404_v10 = vcombine.high %v4958_v3, %v4958_v3  ;;  %v386_v11 = vld [vmem:[%s6020_s3 + $0x278] sm:$0xff] }
  0x24   : > { %430 = vmatprep.subr.mxu0 %v317_v37  ;;  %4445 = vmatpush3.msra.mxu1 %v327_v50  ;;  %v385_v12 = vld [vmem:[%s6020_s3 + $0x270] sm:$0xff]  ;;  %v383_v14 = vld [vmem:[%s6020_s3 + $0x260] sm:$0xff]  ;;  %v382_v15 = vld [vmem:[%s6020_s3 + $0x258] sm:$0xff] }
  0x25   : > { %431 = vmatpush1.msra.mxu0 %v316_v39  ;;  %4446 = vmatprep.subr.mxu1 %v372_v52  ;;  %v309_v13 = vld [vmem:[%s6020_s3 + $0x10] sm:$0xff]  ;;  %v380_v16 = vld [vmem:[%s6020_s3 + $0x248] sm:$0xff]  ;;  %v379_v17 = vld [vmem:[%s6020_s3 + $0x240] sm:$0xff] }
  0x26   : > { %432 = vmatprep.subr.mxu0 %v314_v41  ;;  %4447 = vmatpush3.msra.mxu1 %v324_v54  ;;  %v377_v18 = vld [vmem:[%s6020_s3 + $0x230] sm:$0xff]  ;;  %v376_v19 = vld [vmem:[%s6020_s3 + $0x228] sm:$0xff]  ;;  %v374_v20 = vld [vmem:[%s6020_s3 + $0x218] sm:$0xff]  ;;  %v4686_v41 = vmov 0  }
  0x27   : > { %433 = vmatpush1.msra.mxu0 %v313_v43  ;;  %4448 = vmatprep.subr.mxu1 %v369_v56  ;;  %v373_v21 = vld [vmem:[%s6020_s3 + $0x210] sm:$0xff]  ;;  %v371_v22 = vld [vmem:[%s6020_s3 + $0x200] sm:$0xff]  ;;  %v370_v23 = vld [vmem:[%s6020_s3 + $0x1f8] sm:$0xff] }
  0x28   : > { %434 = vmatprep.subr.mxu0 %v311_v45  ;;  %4449 = vmatpush3.msra.mxu1 %v321_v58  ;;  %v368_v24 = vld [vmem:[%s6020_s3 + $0x1e8] sm:$0xff]  ;;  %v367_v25 = vld [vmem:[%s6020_s3 + $0x1e0] sm:$0xff]  ;;  %v365_v26 = vld [vmem:[%s6020_s3 + $0x1d0] sm:$0xff] }
  0x29   : > { %435 = vmatpush1.msra.mxu0 %v310_v47  ;;  %4450 = vmatprep.subr.mxu1 %v366_v60  ;;  %v364_v27 = vld [vmem:[%s6020_s3 + $0x1c8] sm:$0xff]  ;;  %v362_v28 = vld [vmem:[%s6020_s3 + $0x1b8] sm:$0xff]  ;;  %v361_v29 = vld [vmem:[%s6020_s3 + $0x1b0] sm:$0xff] }
  0x2a   : > { %436 = vmatprep.subr.mxu0 %v308_v49  ;;  %4451 = vmatpush3.msra.mxu1 %v318_v62  ;;  %v359_v30 = vld [vmem:[%s6020_s3 + $0x1a0] sm:$0xff]  ;;  %v358_v31 = vld [vmem:[%s6020_s3 + $0x198] sm:$0xff]  ;;  %v356_v32 = vld [vmem:[%s6020_s3 + $0x188] sm:$0xff] }
  0x2b   : > { %437 = vmatpush1.msra.mxu0 %v307_v51  ;;  %4452 = vmatprep.subr.mxu1 %v363_v0  ;;  %v355_v33 = vld [vmem:[%s6020_s3 + $0x180] sm:$0xff]  ;;  %v4313_v47 = vld [vmem:[%s6018_s1 + $0x8] sm:$0xff]  ;;  %v4324_v60 = vld [vmem:[%s6018_s1 + $0x10] sm:$0xff] }
  0x2c   : > { %438 = vmatprep.subr.mxu0 %v401_v53  ;;  %4453 = vmatpush3.msra.mxu1 %v315_v2  ;;  %v2012_v40 = vld [vmem:[%s6019_s2] sm:$0xff] }
  0x2d   : > { %439 = vmatpush2.msra.mxu0 %v400_v55  ;;  %4454 = vmatprep.subr.mxu1 %v360_v5  ;;  %v547_v53 = vld [vmem:[%s6018_s1] sm:$0xff] }
  0x2e   : > { %440 = vmatprep.subr.mxu0 %v398_v57  ;;  %4455 = vmatpush3.msra.mxu1 %v312_v7 }
  0x2f   : > { %441 = vmatpush2.msra.mxu0 %v397_v59  ;;  %4456 = vmatprep.subr.mxu1 %v357_v9  ;;  %v4342_v9 = vld [vmem:[%s6018_s1 + $0x28] sm:$0xff] }
  0x30   : > { %442 = vmatprep.subr.mxu0 %v395_v61  ;;  %470 = vmatprep.mubr.f32.mxu0 %v404_v10 }
  0x31   : > { %443 = vmatpush2.msra.mxu0 %v394_v63  ;;  %4457 = vmatpush3.msra.mxu1 %v309_v13 }
  0x32   : > { %444 = vmatprep.subr.mxu0 %v392_v1  ;;  %541 = vmatprep.mubr.f32.mxu1 %v404_v10 }
  0x33   : > { %445 = vmatpush2.msra.mxu0 %v391_v4  ;;  %542 = vmatmul.mubr.f32.vlgmr.msra.gmra.mxu1 %v4958_v3 }
  0x34   : > { %446 = vmatprep.subr.mxu0 %v389_v6  ;;  %637 = vmatprep.mubr.f32.mxu1 %v4677_v34 }
  0x35   : > { %447 = vmatpush2.msra.mxu0 %v388_v8  ;;  %4666 = vset.pattern.permute.xlu0 %v4686_v41 }
  0x36   : > { %448 = vmatprep.subr.mxu0 %v386_v11  ;;  %4667 = vset.pattern.permute.xlu1 %v4686_v41  ;;  %v2048_v41 = vld [vmem:[%s6023_s6 + $0xd8] sm:$0xff] }
  0x37   : > { %449 = vmatpush2.msra.mxu0 %v385_v12 }
  0x38   : > { %450 = vmatprep.subr.mxu0 %v383_v14 }
  0x39   : > { %451 = vmatpush2.msra.mxu0 %v382_v15  ;;  %v4336_v15 = vld [vmem:[%s6018_s1 + $0x20] sm:$0xff] }
  0x3a   : > { %452 = vmatprep.subr.mxu0 %v380_v16  ;;  %v4348_v16 = vld [vmem:[%s6018_s1 + $0x30] sm:$0xff] }
  0x3b   : > { %453 = vmatpush2.msra.mxu0 %v379_v17 }
  0x3c   : > { %454 = vmatprep.subr.mxu0 %v377_v18 }
  0x3d   : > { %455 = vmatpush2.msra.mxu0 %v376_v19 }
  0x3e   : > { %456 = vmatprep.subr.mxu0 %v374_v20 }
  0x3f   : > { %457 = vmatpush2.msra.mxu0 %v373_v21  ;;  %v4354_v21 = vld [vmem:[%s6018_s1 + $0x38] sm:$0xff] }
  0x40   : > { %458 = vmatprep.subr.mxu0 %v371_v22 }
  0x41   : > { %459 = vmatpush2.msra.mxu0 %v370_v23 }
  0x42   : > { %460 = vmatprep.subr.mxu0 %v368_v24 }
  0x43   : > { %461 = vmatpush2.msra.mxu0 %v367_v25 }
  0x44   : > { %462 = vmatprep.subr.mxu0 %v365_v26  ;;  %v4360_v26 = vld [vmem:[%s6018_s1 + $0x40] sm:$0xff] }
  0x45   : > { %463 = vmatpush2.msra.mxu0 %v364_v27  ;;  %v2067_v27 = vld [vmem:[%s6023_s6 + $0x170] sm:$0xff] }
  0x46   : > { %464 = vmatprep.subr.mxu0 %v362_v28  ;;  %v2066_v28 = vld [vmem:[%s6023_s6 + $0x168] sm:$0xff] }
  0x47   : > { %465 = vmatpush2.msra.mxu0 %v361_v29  ;;  %v2064_v29 = vld [vmem:[%s6023_s6 + $0x158] sm:$0xff] }
  0x48   : > { %466 = vmatprep.subr.mxu0 %v359_v30  ;;  %v2063_v30 = vld [vmem:[%s6023_s6 + $0x150] sm:$0xff] }
  0x49   : > { %467 = vmatpush2.msra.mxu0 %v358_v31  ;;  %v2061_v31 = vld [vmem:[%s6023_s6 + $0x140] sm:$0xff] }
  0x4a   : > { %468 = vmatprep.subr.mxu0 %v356_v32  ;;  %v2060_v32 = vld [vmem:[%s6023_s6 + $0x138] sm:$0xff] }
  0x4b   : > { %469 = vmatpush2.msra.mxu0 %v355_v33  ;;  %v2058_v33 = vld [vmem:[%s6023_s6 + $0x128] sm:$0xff] }
  0x4c   : > { %471 = vmatmul.mubr.f32.vlgmr.msra.gmra.mxu0 %v4958_v3  ;;  %v4330_v3 = vld [vmem:[%s6018_s1 + $0x18] sm:$0xff] }
  0x4d   : > { %1440 = vmatprep.mubr.f32.mxu0 %v4677_v34 }
  0xf3   : > { %v4458_v35 = vpop.f32.mrf.mxu1 }
  0xf5   : > { %v4459_v38 = vpop.f32.mrf.mxu1 }
  0xf6   : > { %v5058_v39 = vadd.f32 %v4459_v38, %v4458_v35  ;;  %v2057_v35 = vld [vmem:[%s6023_s6 + $0x120] sm:$0xff]  ;;  %v2052_v38 = vld [vmem:[%s6023_s6 + $0xf8] sm:$0xff] }
 0x10c   : > { %v5053_v36 = vpop.f32.mrf.mxu0 }
 0x10d   : > { %553 = vrot.lane.b32.xlu1 %v5053_v36, %s4678_s24 }
 0x10e   : > { %v474_v37 = vpop.f32.mrf.mxu0 }
 0x10f   : > { %555 = vrot.lane.b32.xlu0 %v474_v37, %s4678_s24 }
 0x111   : > { %868 = vrot.lane.b32.xlu1 %v474_v37, %s4679_s26 }
 0x113   : > { %557 = vrot.lane.b32.xlu0 %v5058_v39, %s4678_s24 }
 0x115   : > { %866 = vrot.lane.b32.xlu1 %v5053_v36, %s4679_s26 }
 0x117   : > { %870 = vrot.lane.b32.xlu0 %v5058_v39, %s4679_s26 }
 0x119   : > { %1034 = vrot.lane.b32.xlu1 %v5058_v39, %s4680_s29 }
 0x11b   : > { %1032 = vrot.lane.b32.xlu0 %v474_v37, %s4680_s29 }
 0x11d   : > { %1196 = vrot.lane.b32.xlu1 %v474_v37, %s4681_s30 }
 0x11f   : > { %1030 = vrot.lane.b32.xlu0 %v5053_v36, %s4680_s29 }
 0x121   : > { %1194 = vrot.lane.b32.xlu1 %v5053_v36, %s4681_s30 }
 0x123   : > { %1198 = vrot.lane.b32.xlu0 %v5058_v39, %s4681_s30 }
 0x125   : > { %1526 = vrot.lane.b32.xlu1 %v5058_v39, %s4682_s25 }
 0x127   : > { %1362 = vrot.lane.b32.xlu0 %v5058_v39, %s4683_s9 }
 0x129   : > { %1854 = vrot.lane.b32.xlu1 %v5058_v39, %s4684_s10 }
 0x12b   : > { %1690 = vrot.lane.b32.xlu0 %v5058_v39, %s4685_s11 }
 0x12d   : > { %1358 = vrot.lane.b32.xlu1 %v5053_v36, %s4683_s9 }
 0x12f   : > { %1360 = vrot.lane.b32.xlu0 %v474_v37, %s4683_s9 }
 0x131   : > { %1522 = vrot.lane.b32.xlu1 %v5053_v36, %s4682_s25 }
 0x133   : > { %1524 = vrot.lane.b32.xlu0 %v474_v37, %s4682_s25 }
 0x135   : > { %1686 = vrot.lane.b32.xlu1 %v5053_v36, %s4685_s11 }
 0x137   : > { %1688 = vrot.lane.b32.xlu0 %v474_v37, %s4685_s11 }
 0x139   : > { %1850 = vrot.lane.b32.xlu1 %v5053_v36, %s4684_s10 }
 0x13b   : > { %1852 = vrot.lane.b32.xlu0 %v474_v37, %s4684_s10 }
 0x13f   : > { %2015 = vperm.xlu0 %4666, %v2012_v40   ;;  %v2049_v40 = vld [vmem:[%s6023_s6 + $0xe0] sm:$0xff] }
 0x17f   : > { %v554_v42 = vpop.permute.xlu1 %553 }
 0x181   : > { %v556_v43 = vpop.permute.xlu0 %555 }
 0x182   : > { %v560_v48 = vsel %vm559_vm0, %v554_v42, %v556_v43  ;;  %v2046_v42 = vld [vmem:[%s6023_s6 + $0xc8] sm:$0xff] }
 0x183   : > { %v869_v44 = vpop.permute.xlu1 %868 }
 0x185   : > { %v558_v45 = vpop.permute.xlu0 %557 }
 0x186   : > { %v561_v46 = vsel %vm559_vm0, %v556_v43, %v558_v45  ;;  %v2045_v43 = vld [vmem:[%s6023_s6 + $0xc0] sm:$0xff] }
 0x187   : > { %v867_v49 = vpop.permute.xlu1 %866  ;;  %4314 = vmatprep.subr.msk.mxu1 %vm566_vm1, %v561_v46  ;;  %v2040_v46 = vld [vmem:[%s6023_s6 + $0x98] sm:$0xff] }
 0x188   : > { %4315 = vmatpush1.msk.msra.mxu1 %vm566_vm1, %v560_v48  ;;  %v873_v58 = vsel %vm872_vm4, %v867_v49, %v869_v44  ;;  %v2037_v48 = vld [vmem:[%s6023_s6 + $0x80] sm:$0xff]  ;;  %v2036_v49 = vld [vmem:[%s6023_s6 + $0x78] sm:$0xff] }
 0x189   : > { %4316 = vmatmul.mubr.msk.f32.vlgmr.msra.gmra.mxu1 %vm562_vm2, %v4313_v47  ;;  %4546 = vmatprep.subr.mxu1 %v4677_v34  ;;  %v871_v50 = vpop.permute.xlu0 %870 }
 0x18a   : > { %4547 = vmatpush3.msk.msra.mxu1 %vm566_vm1, %v558_v45  ;;  %4548 = vmatprep.mubr.msk.f32.mxu1 %vm4687_vm3, %v4677_v34  ;;  %v874_v56 = vsel %vm872_vm4, %v869_v44, %v871_v50  ;;  %v2043_v44 = vld [vmem:[%s6023_s6 + $0xb0] sm:$0xff]  ;;  %v2042_v45 = vld [vmem:[%s6023_s6 + $0xa8] sm:$0xff] }
 0x18b   : > { %v1035_v51 = vpop.permute.xlu1 %1034  ;;  %4319 = vmatprep.subr.msk.mxu1 %vm566_vm1, %v474_v37  ;;  %v2054_v37 = vld [vmem:[%s6023_s6 + $0x108] sm:$0xff] }
 0x18d   : > { %4549 = vmatmul.mubr.msk.f32.vlgmr.msra.gmra.mxu1 %vm562_vm2, %v4313_v47  ;;  %v1033_v52 = vpop.permute.xlu0 %1032  ;;  %v2039_v47 = vld [vmem:[%s6023_s6 + $0x90] sm:$0xff] }
 0x18e   : > { %4320 = vmatpush1.msk.msra.mxu1 %vm566_vm1, %v5053_v36  ;;  %787 = vmatprep.mubr.f32.mxu1 %v4677_v34  ;;  %v1038_v63 = vsel %vm1036_vm5, %v1033_v52, %v1035_v51  ;;  %v2055_v36 = vld [vmem:[%s6023_s6 + $0x110] sm:$0xff] }
 0x18f   : > { %v1197_v54 = vpop.permute.xlu1 %1196  ;;  %4551 = vmatprep.subr.mxu1 %v4677_v34 }
 0x191   : > { %4321 = vmatmul.mubr.msk.f32.vlgmr.msra.gmra.mxu1 %vm562_vm2, %v547_v53  ;;  %v1031_v55 = vpop.permute.xlu0 %1030 }
 0x192   : > { %4552 = vmatpush3.msk.msra.mxu1 %vm566_vm1, %v5058_v39  ;;  %4553 = vmatprep.mubr.msk.f32.mxu1 %vm4687_vm3, %v4677_v34  ;;  %v1037_v1 = vsel %vm1036_vm5, %v1031_v55, %v1033_v52  ;;  %v2051_v39 = vld [vmem:[%s6023_s6 + $0xf0] sm:$0xff] }
 0x193   : > { %4325 = vmatprep.subr.msk.mxu1 %vm566_vm1, %v874_v56  ;;  %v1195_v57 = vpop.permute.xlu1 %1194  ;;  %v2031_v52 = vld [vmem:[%s6023_s6 + $0x50] sm:$0xff]  ;;  %v2025_v56 = vld [vmem:[%s6023_s6 + $0x20] sm:$0xff] }
 0x194   : > { %v1201_v11 = vsel %vm1200_vm7, %v1195_v57, %v1197_v54  ;;  %v2027_v55 = vld [vmem:[%s6023_s6 + $0x30] sm:$0xff]  ;;  %v2024_v57 = vld [vmem:[%s6023_s6 + $0x18] sm:$0xff] }
 0x195   : > { %4554 = vmatmul.mubr.msk.f32.vlgmr.msra.gmra.mxu1 %vm562_vm2, %v547_v53  ;;  %v1199_v59 = vpop.permute.xlu0 %1198  ;;  %v2030_v53 = vld [vmem:[%s6023_s6 + $0x48] sm:$0xff] }
 0x196   : > { %4326 = vmatpush1.msk.msra.mxu1 %vm566_vm1, %v873_v58  ;;  %948 = vmatprep.mubr.f32.mxu1 %v4677_v34  ;;  %v1202_v6 = vsel %vm1200_vm7, %v1197_v54, %v1199_v59  ;;  %v2028_v54 = vld [vmem:[%s6023_s6 + $0x38] sm:$0xff]  ;;  %v2022_v58 = vld [vmem:[%s6023_s6 + $0x8] sm:$0xff] }
 0x197   : > { %v5135_v61 = vpop.permute.xlu1 %1526  ;;  %4556 = vmatprep.subr.mxu1 %v4677_v34 }
 0x199   : > { %4327 = vmatmul.mubr.msk.f32.vlgmr.msra.gmra.mxu1 %vm562_vm2, %v4324_v60  ;;  %v1363_v62 = vpop.permute.xlu0 %1362 }
 0x19a   : > { %4557 = vmatpush3.msk.msra.mxu1 %vm566_vm1, %v871_v50  ;;  %4558 = vmatprep.mubr.msk.f32.mxu1 %vm4687_vm3, %v4677_v34  ;;  %v2034_v50 = vld [vmem:[%s6023_s6 + $0x68] sm:$0xff] }
 0x19b   : > { %4331 = vmatprep.subr.msk.mxu1 %vm566_vm1, %v1038_v63  ;;  %v5144_v0 = vpop.permute.xlu1 %1854  ;;  %v2111_v63 = vld [vmem:[%s6023_s6 + $0x2d0] sm:$0xff] }
 0x19d   : > { %4559 = vmatmul.mubr.msk.f32.vlgmr.msra.gmra.mxu1 %vm562_vm2, %v4324_v60  ;;  %v5148_v2 = vpop.permute.xlu0 %1690  ;;  %v2115_v60 = vld [vmem:[%s6023_s6 + $0x2f0] sm:$0xff] }
 0x19e   : > { %4332 = vmatpush1.msk.msra.mxu1 %vm566_vm1, %v1037_v1  ;;  %1112 = vmatprep.mubr.f32.mxu1 %v4677_v34  ;;  %v2108_v1 = vld [vmem:[%s6023_s6 + $0x2b8] sm:$0xff] }
 0x19f   : > { %v1359_v4 = vpop.permute.xlu1 %1358  ;;  %4561 = vmatprep.subr.mxu1 %v4677_v34 }
 0x1a1   : > { %4333 = vmatmul.mubr.msk.f32.vlgmr.msra.gmra.mxu1 %vm562_vm2, %v4330_v3  ;;  %v1361_v5 = vpop.permute.xlu0 %1360 }
 0x1a2   : > { %4562 = vmatpush3.msk.msra.mxu1 %vm566_vm1, %v1035_v51  ;;  %v1365_v7 = vsel %vm1364_vm6, %v1359_v4, %v1361_v5  ;;  %v1366_v8 = vsel %vm1364_vm6, %v1361_v5, %v1363_v62  ;;  %4563 = vmatprep.mubr.msk.f32.mxu1 %vm4687_vm3, %v4677_v34  ;;  %v2033_v51 = vld [vmem:[%s6023_s6 + $0x60] sm:$0xff]  ;;  %v2103_v4 = vld [vmem:[%s6023_s6 + $0x290] sm:$0xff]  ;;  %v2102_v5 = vld [vmem:[%s6023_s6 + $0x288] sm:$0xff] }
 0x1a3   : > { %4337 = vmatprep.subr.msk.mxu1 %vm566_vm1, %v1202_v6  ;;  %v1523_v10 = vpop.permute.xlu1 %1522  ;;  %4343 = vmatprep.subr.msk.mxu0 %vm566_vm1, %v1366_v8  ;;  %v2100_v6 = vld [vmem:[%s6023_s6 + $0x278] sm:$0xff]  ;;  %v2097_v8 = vld [vmem:[%s6023_s6 + $0x260] sm:$0xff] }
 0x1a4   : > { %4344 = vmatpush1.msk.msra.mxu0 %vm566_vm1, %v1365_v7  ;;  %v2099_v7 = vld [vmem:[%s6023_s6 + $0x270] sm:$0xff] }
 0x1a5   : > { %4564 = vmatmul.mubr.msk.f32.vlgmr.msra.gmra.mxu1 %vm562_vm2, %v4330_v3  ;;  %4345 = vmatmul.mubr.msk.f32.vlgmr.msra.gmra.mxu0 %vm562_vm2, %v4342_v9  ;;  %v1525_v12 = vpop.permute.xlu0 %1524  ;;  %v2105_v3 = vld [vmem:[%s6023_s6 + $0x2a0] sm:$0xff] }
 0x1a6   : > { %4338 = vmatpush1.msk.msra.mxu1 %vm566_vm1, %v1201_v11  ;;  %v1529_v13 = vsel %vm1528_vm8, %v1523_v10, %v1525_v12  ;;  %v1530_v14 = vsel %vm1528_vm8, %v1525_v12, %v5135_v61  ;;  %1276 = vmatprep.mubr.f32.mxu1 %v4677_v34  ;;  %v2094_v10 = vld [vmem:[%s6023_s6 + $0x248] sm:$0xff]  ;;  %v2093_v11 = vld [vmem:[%s6023_s6 + $0x240] sm:$0xff]  ;;  %v2091_v12 = vld [vmem:[%s6023_s6 + $0x230] sm:$0xff] }
 0x1a7   : > { %v1687_v17 = vpop.permute.xlu1 %1686  ;;  %4349 = vmatprep.subr.msk.mxu0 %vm566_vm1, %v1530_v14  ;;  %4566 = vmatprep.subr.mxu1 %v4677_v34  ;;  %v2088_v14 = vld [vmem:[%s6023_s6 + $0x218] sm:$0xff] }
 0x1a8   : > { %4350 = vmatpush1.msk.msra.mxu0 %vm566_vm1, %v1529_v13  ;;  %1604 = vmatprep.mubr.f32.mxu0 %v4677_v34  ;;  %v2090_v13 = vld [vmem:[%s6023_s6 + $0x228] sm:$0xff] }
 0x1a9   : > { %4339 = vmatmul.mubr.msk.f32.vlgmr.msra.gmra.mxu1 %vm562_vm2, %v4336_v15  ;;  %4351 = vmatmul.mubr.msk.f32.vlgmr.msra.gmra.mxu0 %vm562_vm2, %v4348_v16  ;;  %v1689_v18 = vpop.permute.xlu0 %1688 }
 0x1aa   : > { %4567 = vmatpush3.msk.msra.mxu1 %vm566_vm1, %v1199_v59  ;;  %v1693_v19 = vsel %vm1692_vm9, %v1687_v17, %v1689_v18  ;;  %v1694_v20 = vsel %vm1692_vm9, %v1689_v18, %v5148_v2  ;;  %4568 = vmatprep.mubr.msk.f32.mxu1 %vm4687_vm3, %v4677_v34  ;;  %v2021_v59 = vld [vmem:[%s6023_s6] sm:$0xff]  ;;  %v2084_v17 = vld [vmem:[%s6023_s6 + $0x1f8] sm:$0xff]  ;;  %v2082_v18 = vld [vmem:[%s6023_s6 + $0x1e8] sm:$0xff] }
 0x1ab   : > { %4355 = vmatprep.subr.msk.mxu0 %vm566_vm1, %v1694_v20  ;;  %4571 = vmatprep.subr.mxu1 %v4677_v34  ;;  %v1851_v22 = vpop.permute.xlu1 %1850  ;;  %v2079_v20 = vld [vmem:[%s6023_s6 + $0x1d0] sm:$0xff] }
 0x1ac   : > { %4356 = vmatpush1.msk.msra.mxu0 %vm566_vm1, %v1693_v19  ;;  %1768 = vmatprep.mubr.f32.mxu0 %v4677_v34  ;;  %v2081_v19 = vld [vmem:[%s6023_s6 + $0x1e0] sm:$0xff] }
 0x1ad   : > { %4569 = vmatmul.mubr.msk.f32.vlgmr.msra.gmra.mxu1 %vm562_vm2, %v4336_v15  ;;  %4357 = vmatmul.mubr.msk.f32.vlgmr.msra.gmra.mxu0 %vm562_vm2, %v4354_v21  ;;  %v1853_v23 = vpop.permute.xlu0 %1852  ;;  %v2087_v15 = vld [vmem:[%s6023_s6 + $0x210] sm:$0xff] }
 0x1ae   : > { %4572 = vmatpush3.msk.msra.mxu1 %vm566_vm1, %v1363_v62  ;;  %v1857_v24 = vsel %vm1856_vm10, %v1851_v22, %v1853_v23  ;;  %v1858_v25 = vsel %vm1856_vm10, %v1853_v23, %v5144_v0  ;;  %4573 = vmatprep.mubr.msk.f32.mxu1 %vm4687_vm3, %v4677_v34  ;;  %v2112_v62 = vld [vmem:[%s6023_s6 + $0x2d8] sm:$0xff]  ;;  %v2075_v23 = vld [vmem:[%s6023_s6 + $0x1b0] sm:$0xff] }
 0x1af   : > { %4361 = vmatprep.subr.msk.mxu0 %vm566_vm1, %v1858_v25  ;;  %4576 = vmatprep.subr.mxu1 %v4677_v34  ;;  %v2076_v22 = vld [vmem:[%s6023_s6 + $0x1b8] sm:$0xff] }
 0x1b0   : > { %4362 = vmatpush1.msk.msra.mxu0 %vm566_vm1, %v1857_v24  ;;  %1932 = vmatprep.mubr.f32.mxu0 %v4677_v34  ;;  %v2073_v24 = vld [vmem:[%s6023_s6 + $0x1a0] sm:$0xff]  ;;  %v2072_v25 = vld [vmem:[%s6023_s6 + $0x198] sm:$0xff] }
 0x1b1   : > { %4574 = vmatmul.mubr.msk.f32.vlgmr.msra.gmra.mxu1 %vm562_vm2, %v4342_v9  ;;  %4363 = vmatmul.mubr.msk.f32.vlgmr.msra.gmra.mxu0 %vm562_vm2, %v4360_v26  ;;  %v2096_v9 = vld [vmem:[%s6023_s6 + $0x258] sm:$0xff] }
 0x1b2   : > { %4577 = vmatpush3.msk.msra.mxu1 %vm566_vm1, %v5135_v61  ;;  %4578 = vmatprep.mubr.msk.f32.mxu1 %vm4687_vm3, %v4677_v34  ;;  %v2114_v61 = vld [vmem:[%s6023_s6 + $0x2e8] sm:$0xff] }
 0x1b3   : > { %4581 = vmatprep.subr.mxu1 %v4677_v34  ;;  %2133 = vmatprep.subr.mxu0 %v2067_v27  ;;  %v2069_v27 = vld [vmem:[%s6023_s6 + $0x180] sm:$0xff] }
 0x1b4   : > { %2134 = vmatpush1.msra.mxu0 %v2066_v28  ;;  %v2127_v28 = vld [vmem:[%s6023_s6 + $0x350] sm:$0xff] }
 0x1b5   : > { %4579 = vmatmul.mubr.msk.f32.vlgmr.msra.gmra.mxu1 %vm562_vm2, %v4348_v16  ;;  %2135 = vmatprep.subr.mxu0 %v2064_v29  ;;  %v2085_v16 = vld [vmem:[%s6023_s6 + $0x200] sm:$0xff]  ;;  %v2126_v29 = vld [vmem:[%s6023_s6 + $0x348] sm:$0xff] }
 0x1b6   : > { %4582 = vmatpush3.msk.msra.mxu1 %vm566_vm1, %v5148_v2  ;;  %4583 = vmatprep.mubr.msk.f32.mxu1 %vm4687_vm3, %v4677_v34  ;;  %v2106_v2 = vld [vmem:[%s6023_s6 + $0x2a8] sm:$0xff] }
 0x1b7   : > { %4586 = vmatprep.subr.mxu1 %v4677_v34  ;;  %2136 = vmatpush1.msra.mxu0 %v2063_v30  ;;  %v2124_v30 = vld [vmem:[%s6023_s6 + $0x338] sm:$0xff] }
 0x1b8   : > { %2137 = vmatprep.subr.mxu0 %v2061_v31  ;;  %v2123_v31 = vld [vmem:[%s6023_s6 + $0x330] sm:$0xff] }
 0x1b9   : > { %4584 = vmatmul.mubr.msk.f32.vlgmr.msra.gmra.mxu1 %vm562_vm2, %v4354_v21  ;;  %2138 = vmatpush1.msra.mxu0 %v2060_v32  ;;  %v2078_v21 = vld [vmem:[%s6023_s6 + $0x1c8] sm:$0xff]  ;;  %v2121_v32 = vld [vmem:[%s6023_s6 + $0x320] sm:$0xff] }
 0x1ba   : > { %4587 = vmatpush3.msk.msra.mxu1 %vm566_vm1, %v5144_v0  ;;  %4588 = vmatprep.mubr.msk.f32.mxu1 %vm4687_vm3, %v4677_v34  ;;  %v2109_v0 = vld [vmem:[%s6023_s6 + $0x2c0] sm:$0xff] }
 0x1bb   : > { %2139 = vmatprep.subr.mxu0 %v2058_v33  ;;  %2228 = vmatprep.subr.mxu1 %v2127_v28  ;;  %v2120_v33 = vld [vmem:[%s6023_s6 + $0x318] sm:$0xff] }
 0x1bc   : > { %2140 = vmatpush1.msra.mxu0 %v2057_v35  ;;  %v2118_v35 = vld [vmem:[%s6023_s6 + $0x308] sm:$0xff] }
 0x1bd   : > { %4589 = vmatmul.mubr.msk.f32.vlgmr.msra.gmra.mxu1 %vm562_vm2, %v4360_v26  ;;  %2141 = vmatprep.subr.mxu0 %v2055_v36  ;;  %v2070_v26 = vld [vmem:[%s6023_s6 + $0x188] sm:$0xff]  ;;  %v2117_v36 = vld [vmem:[%s6023_s6 + $0x300] sm:$0xff] }
 0x1be   : > { %2142 = vmatpush1.msra.mxu0 %v2054_v37  ;;  %2268 = vmatprep.mubr.f32.mxu1 %v4677_v34  ;;  %v2116_v37 = vld [vmem:[%s6023_s6 + $0x2f8] sm:$0xff] }
 0x1bf   : > { %2143 = vmatprep.subr.mxu0 %v2052_v38  ;;  %2229 = vmatpush1.msra.mxu1 %v2126_v29 }
 0x1c0   : > { %2144 = vmatpush1.msra.mxu0 %v2051_v39  ;;  %2230 = vmatprep.subr.mxu1 %v2124_v30 }
 0x1c1   : > { %2145 = vmatprep.subr.mxu0 %v2049_v40  ;;  %2231 = vmatpush1.msra.mxu1 %v2123_v31 }
 0x1c2   : > { %2146 = vmatpush1.msra.mxu0 %v2048_v41  ;;  %2232 = vmatprep.subr.mxu1 %v2121_v32 }
 0x1c3   : > { %2147 = vmatprep.subr.mxu0 %v2046_v42  ;;  %2233 = vmatpush1.msra.mxu1 %v2120_v33 }
 0x1c4   : > { %2148 = vmatpush1.msra.mxu0 %v2045_v43  ;;  %2234 = vmatprep.subr.mxu1 %v2118_v35 }
 0x1c5   : > { %2149 = vmatprep.subr.mxu0 %v2043_v44  ;;  %2235 = vmatpush1.msra.mxu1 %v2117_v36 }
 0x1c6   : > { %2150 = vmatpush1.msra.mxu0 %v2042_v45  ;;  %4479 = vmatprep.subr.mxu1 %v2116_v37 }
 0x1c7   : > { %2151 = vmatprep.subr.mxu0 %v2040_v46 }
 0x1c8   : > { %2152 = vmatpush1.msra.mxu0 %v2039_v47 }
 0x1c9   : > { %2153 = vmatprep.subr.mxu0 %v2037_v48 }
 0x1ca   : > { %2154 = vmatpush1.msra.mxu0 %v2036_v49 }
 0x1cb   : > { %2155 = vmatprep.subr.mxu0 %v2034_v50 }
 0x1cc   : > { %2156 = vmatpush1.msra.mxu0 %v2033_v51 }
 0x1cd   : > { %2157 = vmatprep.subr.mxu0 %v2031_v52 }
 0x1ce   : > { %2158 = vmatpush1.msra.mxu0 %v2030_v53 }
 0x1cf   : > { %2159 = vmatprep.subr.mxu0 %v2028_v54 }
 0x1d0   : > { %2160 = vmatpush1.msra.mxu0 %v2027_v55 }
 0x1d1   : > { %2161 = vmatprep.subr.mxu0 %v2025_v56 }
 0x1d2   : > { %2162 = vmatpush1.msra.mxu0 %v2024_v57 }
 0x1d3   : > { %2163 = vmatprep.subr.mxu0 %v2022_v58 }
 0x1d4   : > { %2164 = vmatpush1.msra.mxu0 %v2021_v59 }
 0x1d5   : > { %2165 = vmatprep.subr.mxu0 %v2115_v60 }
 0x1d6   : > { %2166 = vmatpush2.msra.mxu0 %v2114_v61 }
 0x1d7   : > { %2167 = vmatprep.subr.mxu0 %v2112_v62 }
 0x1d8   : > { %2168 = vmatpush2.msra.mxu0 %v2111_v63 }
 0x1d9   : > { %2169 = vmatprep.subr.mxu0 %v2109_v0 }
 0x1da   : > { %2170 = vmatpush2.msra.mxu0 %v2108_v1 }
 0x1db   : > { %2171 = vmatprep.subr.mxu0 %v2106_v2 }
 0x1dc   : > { %2172 = vmatpush2.msra.mxu0 %v2105_v3 }
 0x1dd   : > { %2173 = vmatprep.subr.mxu0 %v2103_v4 }
 0x1de   : > { %2174 = vmatpush2.msra.mxu0 %v2102_v5 }
 0x1df   : > { %2175 = vmatprep.subr.mxu0 %v2100_v6 }
 0x1e0   : > { %2176 = vmatpush2.msra.mxu0 %v2099_v7 }
 0x1e1   : > { %2177 = vmatprep.subr.mxu0 %v2097_v8 }
 0x1e2   : > { %2178 = vmatpush2.msra.mxu0 %v2096_v9 }
 0x1e3   : > { %2179 = vmatprep.subr.mxu0 %v2094_v10 }
 0x1e4   : > { %2180 = vmatpush2.msra.mxu0 %v2093_v11 }
 0x1e5   : > { %2181 = vmatprep.subr.mxu0 %v2091_v12 }
 0x1e6   : > { %2182 = vmatpush2.msra.mxu0 %v2090_v13 }
 0x1e7   : > { %2183 = vmatprep.subr.mxu0 %v2088_v14 }
 0x1e8   : > { %2184 = vmatpush2.msra.mxu0 %v2087_v15 }
 0x1e9   : > { %2185 = vmatprep.subr.mxu0 %v2085_v16 }
 0x1ea   : > { %2186 = vmatpush2.msra.mxu0 %v2084_v17 }
 0x1eb   : > { %2187 = vmatprep.subr.mxu0 %v2082_v18 }
 0x1ec   : > { %2188 = vmatpush2.msra.mxu0 %v2081_v19 }
 0x1ed   : > { %2189 = vmatprep.subr.mxu0 %v2079_v20 }
 0x1ee   : > { %2190 = vmatpush2.msra.mxu0 %v2078_v21 }
 0x1ef   : > { %2191 = vmatprep.subr.mxu0 %v2076_v22 }
 0x1f0   : > { %2192 = vmatpush2.msra.mxu0 %v2075_v23  ;;  %v2016_v23 = vpop.permute.xlu0 %2015 }
 0x1f1   : > { %2193 = vmatprep.subr.mxu0 %v2073_v24 }
 0x1f2   : > { %2194 = vmatpush2.msra.mxu0 %v2072_v25 }
 0x1f3   : > { %2195 = vmatprep.subr.mxu0 %v2070_v26 }
 0x1f4   : > { %2196 = vmatpush2.msra.mxu0 %v2069_v27 }
 0x249   : > { %v639_v38 = vpop.f32.mrf.mxu1 }
 0x24b   : > { %v641_v39 = vpop.f32.mrf.mxu1 }
 0x24d   : > { %v710_v40 = vpop.f32.mrf.mxu1 }
 0x24f   : > { %v4550_v41 = vpop.f32.mrf.mxu1 }
 0x250   : > { %v2065_v41 = vld [vmem:[%s6023_s6 + $0x160] sm:$0xff] }
 0x251   : > { %v789_v42 = vpop.f32.mrf.mxu1 }
 0x252   : > { %v790_v52 = vadd.f32 %v789_v42, %v639_v38  ;;  %v2110_v42 = vld [vmem:[%s6023_s6 + $0x2c8] sm:$0xff] }
 0x253   : > { %v791_v43 = vpop.f32.mrf.mxu1 }
 0x254   : > { %v792_v55 = vadd.f32 %v791_v43, %v641_v39  ;;  %v2068_v39 = vld [vmem:[%s6023_s6 + $0x178] sm:$0xff]  ;;  %v2062_v43 = vld [vmem:[%s6023_s6 + $0x148] sm:$0xff] }
 0x255   : > { %v860_v44 = vpop.f32.mrf.mxu1 }
 0x256   : > { %v861_v11 = vadd.f32 %v860_v44, %v710_v40  ;;  %v2113_v40 = vld [vmem:[%s6023_s6 + $0x2e0] sm:$0xff]  ;;  %v2107_v44 = vld [vmem:[%s6023_s6 + $0x2b0] sm:$0xff] }
 0x257   : > { %v4555_v45 = vpop.f32.mrf.mxu1 }
 0x258   : > { %v2059_v45 = vld [vmem:[%s6023_s6 + $0x130] sm:$0xff] }
 0x259   : > { %v950_v46 = vpop.f32.mrf.mxu1 }
 0x25a   : > { %v1025_v56 = vadd.f32 %v950_v46, %v790_v52  ;;  %v2104_v46 = vld [vmem:[%s6023_s6 + $0x298] sm:$0xff]  ;;  %v2095_v52 = vld [vmem:[%s6023_s6 + $0x250] sm:$0xff] }
 0x25b   : > { %v952_v47 = vpop.f32.mrf.mxu1 }
 0x25c   : > { %v1026_v59 = vadd.f32 %v952_v47, %v792_v55  ;;  %v2056_v47 = vld [vmem:[%s6023_s6 + $0x118] sm:$0xff] }
 0x25d   : > { %v1021_v48 = vpop.f32.mrf.mxu1  ;;  %v2044_v55 = vld [vmem:[%s6023_s6 + $0xb8] sm:$0xff] }
 0x25e   : > { %v1027_v16 = vadd.f32 %v1021_v48, %v861_v11  ;;  %v2101_v48 = vld [vmem:[%s6023_s6 + $0x280] sm:$0xff] }
 0x25f   : > { %v4560_v49 = vpop.f32.mrf.mxu1 }
 0x260   : > { %v2053_v49 = vld [vmem:[%s6023_s6 + $0x100] sm:$0xff] }
 0x261   : > { %v1114_v50 = vpop.f32.mrf.mxu1 }
 0x262   : > { %v1189_v60 = vadd.f32 %v1114_v50, %v1025_v56  ;;  %v2098_v50 = vld [vmem:[%s6023_s6 + $0x268] sm:$0xff]  ;;  %v2089_v56 = vld [vmem:[%s6023_s6 + $0x220] sm:$0xff] }
 0x263   : > { %v1116_v51 = vpop.f32.mrf.mxu1 }
 0x264   : > { %v1190_v63 = vadd.f32 %v1116_v51, %v1026_v59  ;;  %v2050_v51 = vld [vmem:[%s6023_s6 + $0xe8] sm:$0xff] }
 0x265   : > { %v1185_v53 = vpop.f32.mrf.mxu1  ;;  %v1442_v54 = vpop.f32.mrf.mxu0  ;;  %v2038_v59 = vld [vmem:[%s6023_s6 + $0x88] sm:$0xff] }
 0x266   : > { %v1191_v21 = vadd.f32 %v1185_v53, %v1027_v16  ;;  %v2047_v53 = vld [vmem:[%s6023_s6 + $0xd0] sm:$0xff] }
 0x267   : > { %v4565_v57 = vpop.f32.mrf.mxu1  ;;  %v1444_v58 = vpop.f32.mrf.mxu0 }
 0x268   : > { %v2041_v57 = vld [vmem:[%s6023_s6 + $0xa0] sm:$0xff] }
 0x269   : > { %v1278_v61 = vpop.f32.mrf.mxu1  ;;  %v1606_v62 = vpop.f32.mrf.mxu0 }
 0x26a   : > { %v1353_v0 = vadd.f32 %v1278_v61, %v1189_v60  ;;  %v2083_v60 = vld [vmem:[%s6023_s6 + $0x1f0] sm:$0xff] }
 0x26b   : > { %v1280_v1 = vpop.f32.mrf.mxu1  ;;  %v1608_v2 = vpop.f32.mrf.mxu0  ;;  %v2035_v61 = vld [vmem:[%s6023_s6 + $0x70] sm:$0xff] }
 0x26c   : > { %v1517_v3 = vadd.f32 %v1442_v54, %v1353_v0  ;;  %v1354_v4 = vadd.f32 %v1280_v1, %v1190_v63  ;;  %v2092_v54 = vld [vmem:[%s6023_s6 + $0x238] sm:$0xff]  ;;  %v2077_v0 = vld [vmem:[%s6023_s6 + $0x1c0] sm:$0xff] }
 0x26d   : > { %v1349_v5 = vpop.f32.mrf.mxu1  ;;  %v1770_v6 = vpop.f32.mrf.mxu0  ;;  %v2032_v63 = vld [vmem:[%s6023_s6 + $0x58] sm:$0xff]  ;;  %v2029_v1 = vld [vmem:[%s6023_s6 + $0x40] sm:$0xff] }
 0x26e   : > { %v1681_v7 = vadd.f32 %v1606_v62, %v1517_v3  ;;  %v1518_v8 = vadd.f32 %v1444_v58, %v1354_v4  ;;  %v1355_v25 = vadd.f32 %v1349_v5, %v1191_v21  ;;  %v2086_v58 = vld [vmem:[%s6023_s6 + $0x208] sm:$0xff]  ;;  %v2080_v62 = vld [vmem:[%s6023_s6 + $0x1d8] sm:$0xff]  ;;  %v2071_v4 = vld [vmem:[%s6023_s6 + $0x190] sm:$0xff] }
 0x26f   : > { %v4570_v9 = vpop.f32.mrf.mxu1  ;;  %v1772_v10 = vpop.f32.mrf.mxu0  ;;  %v2026_v3 = vld [vmem:[%s6023_s6 + $0x28] sm:$0xff]  ;;  %v2023_v5 = vld [vmem:[%s6023_s6 + $0x10] sm:$0xff] }
 0x270   : > { %v1682_v12 = vadd.f32 %v1608_v2, %v1518_v8  ;;  %v1845_v13 = vadd.f32 %v1770_v6, %v1681_v7  ;;  %v2074_v2 = vld [vmem:[%s6023_s6 + $0x1a8] sm:$0xff]  ;;  %v2128_v6 = vld [vmem:[%s6023_s6 + $0x358] sm:$0xff]  ;;  %v2125_v7 = vld [vmem:[%s6023_s6 + $0x340] sm:$0xff] }
 0x271   : > { %v1513_v14 = vpop.f32.mrf.mxu1  ;;  %v1934_v15 = vpop.f32.mrf.mxu0  ;;  %v2122_v8 = vld [vmem:[%s6023_s6 + $0x328] sm:$0xff]  ;;  %v2119_v9 = vld [vmem:[%s6023_s6 + $0x310] sm:$0xff] }
 0x272   : > { %v1846_v17 = vadd.f32 %v1772_v10, %v1682_v12  ;;  %v2009_v18 = vadd.f32 %v1934_v15, %v1845_v13  ;;  %v1519_v29 = vadd.f32 %v1513_v14, %v1355_v25  ;;  %v4069_v25 = vld [vmem:[%s6022_s5] sm:$0xff] }
 0x273   : > { %v4575_v19 = vpop.f32.mrf.mxu1  ;;  %v1936_v20 = vpop.f32.mrf.mxu0 }
 0x274   : > { %v2010_v22 = vadd.f32 %v1936_v20, %v1846_v17  ;;  %v5456_v27 = vadd.f32 %v2016_v23, %v2009_v18  ;;  %v5586_v19 = vld [vmem:[%s6021_s4] sm:$0xff] }
 0x275   : > { %v1677_v24 = vpop.f32.mrf.mxu1 }
 0x276   : > { %v2019_v26 = vadd.f32 %v2016_v23, %v2010_v22  ;;  %v1683_v31 = vadd.f32 %v1677_v24, %v1519_v29  ;;  %v5609_v24 = vld [vmem:[%s6021_s4 + $0x30] sm:$0xff] }
 0x277   : > { %v4580_v28 = vpop.f32.mrf.mxu1 }
 0x278   : > { %2197 = vmatprep.mubr.f32.mxu0 %v2019_v26 }
 0x279   : > { %v1841_v30 = vpop.f32.mrf.mxu1  ;;  %2198 = vmatmul.mubr.f32.vlgmr.msra.gmra.mxu0 %v5456_v27 }
 0x27a   : > { %v1847_v33 = vadd.f32 %v1841_v30, %v1683_v31  ;;  %4609 = vmatprep.mubr.msk.f32.mxu0 %vm2434_vm12, %v5586_v19  ;;  %v4368_v31 = vld [vmem:[%s6021_s4 + $0x10] sm:$0xff] }
 0x27b   : > { %v4585_v32 = vpop.f32.mrf.mxu1 }
 0x27d   : > { %v2005_v35 = vpop.f32.mrf.mxu1 }
 0x27e   : > { %v2011_v36 = vadd.f32 %v2005_v35, %v1847_v33 }
 0x27f   : > { %v4590_v37 = vpop.f32.mrf.mxu1 }
 0x280   : > { %v5459_v38 = vadd.f32 %v2016_v23, %v2011_v36  ;;  %v5593_v23 = vld [vmem:[%s6021_s4 + $0x8] sm:$0xff]  ;;  %v4369_v36 = vld [vmem:[%s6021_s4 + $0x18] sm:$0xff] }
 0x282   : > { %4366 = vmatmul.mubr.msk.f32.vlgmr.msra.gmra.mxu1 %vm2129_vm11, %v5459_v38 }
 0x283   : > { %4480 = vmatpush3.msra.mxu1 %v2068_v39  ;;  %2339 = vmatprep.mubr.f32.mxu1 %v2019_v26 }
 0x284   : > { %4481 = vmatprep.subr.mxu1 %v2113_v40 }
 0x285   : > { %4482 = vmatpush3.msra.mxu1 %v2065_v41  ;;  %v4385_v41 = vld [vmem:[%s6021_s4 + $0x38] sm:$0xff] }
 0x286   : > { %4483 = vmatprep.subr.mxu1 %v2110_v42 }
 0x287   : > { %4484 = vmatpush3.msra.mxu1 %v2062_v43  ;;  %v5659_v43 = vld [vmem:[%s6021_s4 + $0x50] sm:$0xff] }
 0x288   : > { %4485 = vmatprep.subr.mxu1 %v2107_v44 }
 0x289   : > { %4486 = vmatpush3.msra.mxu1 %v2059_v45 }
 0x28a   : > { %4487 = vmatprep.subr.mxu1 %v2104_v46 }
 0x28b   : > { %4488 = vmatpush3.msra.mxu1 %v2056_v47 }
 0x28c   : > { %4489 = vmatprep.subr.mxu1 %v2101_v48 }
 0x28d   : > { %4490 = vmatpush3.msra.mxu1 %v2053_v49  ;;  %v4378_v49 = vld [vmem:[%s6021_s4 + $0x20] sm:$0xff] }
 0x28e   : > { %4491 = vmatprep.subr.mxu1 %v2098_v50 }
 0x28f   : > { %4492 = vmatpush3.msra.mxu1 %v2050_v51 }
 0x290   : > { %4493 = vmatprep.subr.mxu1 %v2095_v52  ;;  %v5685_v52 = vld [vmem:[%s6021_s4 + $0x58] sm:$0xff] }
 0x291   : > { %4494 = vmatpush3.msra.mxu1 %v2047_v53 }
 0x292   : > { %4495 = vmatprep.subr.mxu1 %v2092_v54  ;;  %v4379_v54 = vld [vmem:[%s6021_s4 + $0x28] sm:$0xff] }
 0x293   : > { %4496 = vmatpush3.msra.mxu1 %v2044_v55  ;;  %v5694_v55 = vld [vmem:[%s6021_s4 + $0x70] sm:$0xff] }
 0x294   : > { %4497 = vmatprep.subr.mxu1 %v2089_v56 }
 0x295   : > { %4498 = vmatpush3.msra.mxu1 %v2041_v57 }
 0x296   : > { %4499 = vmatprep.subr.mxu1 %v2086_v58 }
 0x297   : > { %4500 = vmatpush3.msra.mxu1 %v2038_v59 }
 0x298   : > { %4501 = vmatprep.subr.mxu1 %v2083_v60 }
 0x299   : > { %4502 = vmatpush3.msra.mxu1 %v2035_v61 }
 0x29a   : > { %4503 = vmatprep.subr.mxu1 %v2080_v62 }
 0x29b   : > { %4504 = vmatpush3.msra.mxu1 %v2032_v63 }
 0x29c   : > { %4505 = vmatprep.subr.mxu1 %v2077_v0  ;;  %v4409_v0 = vld [vmem:[%s6021_s4 + $0x78] sm:$0xff] }
 0x29d   : > { %4506 = vmatpush3.msra.mxu1 %v2029_v1 }
 0x29e   : > { %4507 = vmatprep.subr.mxu1 %v2074_v2 }
 0x29f   : > { %4508 = vmatpush3.msra.mxu1 %v2026_v3 }
 0x2a0   : > { %4509 = vmatprep.subr.mxu1 %v2071_v4  ;;  %v4390_v4 = vld [vmem:[%s6021_s4 + $0x40] sm:$0xff] }
 0x2a1   : > { %4510 = vmatpush3.msra.mxu1 %v2023_v5 }
 0x2a2   : > { %2340 = vmatmul.mubr.f32.vlgmr.msra.gmra.mxu1 %v5456_v27  ;;  %4591 = vmatprep.subr.mxu1 %v4677_v34 }
 0x2a3   : > { %4592 = vmatpush3.msra.mxu1 %v2128_v6  ;;  %4599 = vmatprep.mubr.msk.f32.mxu1 %vm4687_vm3, %v4677_v34  ;;  %v4414_v6 = vld [vmem:[%s6021_s4 + $0x80] sm:$0xff] }
 0x2a4   : > { %4593 = vmatprep.subr.mxu1 %v4677_v34 }
 0x2a5   : > { %4594 = vmatpush3.msra.mxu1 %v2125_v7 }
 0x2a6   : > { %4595 = vmatprep.subr.mxu1 %v4677_v34 }
 0x2a7   : > { %4596 = vmatpush3.msra.mxu1 %v2122_v8 }
 0x2a8   : > { %4597 = vmatprep.subr.mxu1 %v4677_v34 }
 0x2a9   : > { %4598 = vmatpush3.msra.mxu1 %v2119_v9  ;;  %v4391_v9 = vld [vmem:[%s6021_s4 + $0x48] sm:$0xff] }
 0x2aa   : > { %4600 = vmatmul.mubr.msk.f32.vlgmr.msra.gmra.mxu1 %vm2129_vm11, %v5459_v38 }
 0x2ab   : > { %2505 = vmatprep.mubr.f32.mxu1 %v4677_v34 }
 0x339   : > { %v2199_v10 = vpop.f32.mrf.mxu0 }
 0x33b   : > { %v2201_v13 = vpop.f32.mrf.mxu0 }
 0x342   : > { %v2270_v11 = vpop.f32.mrf.mxu1 }
 0x343   : > { %v5578_v12 = vadd.f32 %v2270_v11, %v2199_v10  ;;  %v4415_v10 = vld [vmem:[%s6021_s4 + $0x88] sm:$0xff] }
 0x344   : > { %v2272_v14 = vpop.f32.mrf.mxu1 }
 0x345   : > { %v2273_v15 = vadd.f32 %v2272_v14, %v2201_v13  ;;  %2423 = vrot.lane.b32.xlu0 %v5578_v12, %s4678_s24  ;;  %v4402_v14 = vld [vmem:[%s6021_s4 + $0x60] sm:$0xff] }
 0x347   : > { %2425 = vrot.lane.b32.xlu1 %v2273_v15, %s4678_s24 }
 0x362   : > { %v4511_v16 = vpop.f32.mrf.mxu1 }
 0x364   : > { %v4512_v17 = vpop.f32.mrf.mxu1 }
 0x365   : > { %v4513_v18 = vadd.f32 %v4512_v17, %v4511_v16  ;;  %v4403_v16 = vld [vmem:[%s6021_s4 + $0x68] sm:$0xff] }
 0x36a   : > { %v2411_v20 = vpop.f32.mrf.mxu1 }
 0x36b   : > { %v2412_v21 = vadd.f32 %v4513_v18, %v2411_v20  ;;  %v4028_v18 = vld [vmem:[%s6024_s7 + $0xf8] sm:$0xff]  ;;  %v4026_v20 = vld [vmem:[%s6024_s7 + $0xe8] sm:$0xff] }
 0x36c   : > { %v4601_v22 = vpop.f32.mrf.mxu1 }
 0x36d   : > { %4607 = vmatprep.subr.mxu0 %v2412_v21  ;;  %2758 = vrot.lane.b32.xlu0 %v2412_v21, %s4679_s26  ;;  %v4024_v22 = vld [vmem:[%s6024_s7 + $0xd8] sm:$0xff] }
 0x36e   : > { %2427 = vrot.lane.b32.xlu1 %v2412_v21, %s4678_s24  ;;  %4608 = vmatpush3.msra.mxu0 %v2412_v21 }
 0x36f   : > { %4610 = vmatmul.mubr.msk.f32.vlgmr.msra.gmra.mxu0 %vm2434_vm12, %v5593_v23 }
 0x370   : > { %4619 = vmatprep.mubr.msk.f32.mxu0 %vm2434_vm12, %v5609_v24 }
 0x371   : > { %2934 = vrot.lane.b32.xlu0 %v2273_v15, %s4680_s29 }
 0x372   : > { %2756 = vrot.lane.b32.xlu1 %v2273_v15, %s4679_s26 }
 0x375   : > { %2932 = vrot.lane.b32.xlu0 %v5578_v12, %s4680_s29 }
 0x376   : > { %2754 = vrot.lane.b32.xlu1 %v5578_v12, %s4679_s26  ;;  %s305_s26 = scalar_lea.vmem %s6025_s8, %s4425_s12 }
 0x379   : > { %3114 = vrot.lane.b32.xlu0 %v2412_v21, %s4681_s30 }
 0x37a   : > { %2936 = vrot.lane.b32.xlu1 %v2412_v21, %s4680_s29 }
 0x37d   : > { %3290 = vrot.lane.b32.xlu0 %v2273_v15, %s4683_s9 }
 0x37e   : > { %3112 = vrot.lane.b32.xlu1 %v2273_v15, %s4681_s30 }
 0x381   : > { %3288 = vrot.lane.b32.xlu0 %v5578_v12, %s4683_s9 }
 0x382   : > { %3110 = vrot.lane.b32.xlu1 %v5578_v12, %s4681_s30 }
 0x385   : > { %3470 = vrot.lane.b32.xlu0 %v2412_v21, %s4682_s25 }
 0x386   : > { %3292 = vrot.lane.b32.xlu1 %v2412_v21, %s4683_s9 }
 0x389   : > { %3646 = vrot.lane.b32.xlu0 %v2273_v15, %s4685_s11 }
 0x38a   : > { %3468 = vrot.lane.b32.xlu1 %v2273_v15, %s4682_s25 }
 0x38d   : > { %3644 = vrot.lane.b32.xlu0 %v5578_v12, %s4685_s11 }
 0x38e   : > { %3466 = vrot.lane.b32.xlu1 %v5578_v12, %s4682_s25 }
 0x391   : > { %3826 = vrot.lane.b32.xlu0 %v2412_v21, %s4684_s10 }
 0x392   : > { %3648 = vrot.lane.b32.xlu1 %v2412_v21, %s4685_s11  ;;  %v4025_v21 = vld [vmem:[%s6024_s7 + $0xe0] sm:$0xff] }
 0x395   : > { %4073 = vperm.xlu0 %4666, %v4069_v25   ;;  %v4021_v25 = vld [vmem:[%s6024_s7 + $0xc0] sm:$0xff] }
 0x396   : > { %3824 = vrot.lane.b32.xlu1 %v2273_v15, %s4684_s10 }
 0x39a   : > { %3822 = vrot.lane.b32.xlu1 %v5578_v12, %s4684_s10 }
 0x3b7   : > { %v2424_v26 = vpop.permute.xlu0 %2423 }
 0x3b9   : > { %v2426_v27 = vpop.permute.xlu1 %2425 }
 0x3ba   : > { %v2429_v32 = vsel %vm559_vm0, %v2424_v26, %v2426_v27  ;;  %v4020_v26 = vld [vmem:[%s6024_s7 + $0xb8] sm:$0xff] }
 0x3df   : > { %v2759_v28 = vpop.permute.xlu0 %2758 }
 0x3e0   : > { %v2428_v29 = vpop.permute.xlu1 %2427 }
 0x3e1   : > { %v2430_v30 = vsel %vm559_vm0, %v2426_v27, %v2428_v29  ;;  %v4019_v27 = vld [vmem:[%s6024_s7 + $0xb0] sm:$0xff] }
 0x3e2   : > { %2471 = vmatprep.subr.mxu1 %v2430_v30  ;;  %v4016_v30 = vld [vmem:[%s6024_s7 + $0x98] sm:$0xff] }
 0x3e3   : > { %2472 = vmatpush1.msra.mxu1 %v2429_v32  ;;  %v2935_v33 = vpop.permute.xlu0 %2934  ;;  %v4014_v32 = vld [vmem:[%s6024_s7 + $0x88] sm:$0xff] }
 0x3e4   : > { %4370 = vmatmul.mubr.msk.f32.vlgmr.msra.gmra.mxu1 %vm2434_vm12, %v4368_v31  ;;  %4602 = vmatprep.subr.mxu1 %v2428_v29  ;;  %v2757_v35 = vpop.permute.xlu1 %2756 }
 0x3e5   : > { %4603 = vmatpush3.msra.mxu1 %v2428_v29  ;;  %2511 = vmatprep.mubr.f32.mxu1 %v4677_v34  ;;  %v2761_v42 = vsel %vm872_vm4, %v2757_v35, %v2759_v28  ;;  %v4017_v29 = vld [vmem:[%s6024_s7 + $0xa0] sm:$0xff] }
 0x3e6   : > { %2629 = vmatprep.subr.mxu1 %v2273_v15 }
 0x3e7   : > { %v2933_v37 = vpop.permute.xlu0 %2932 }
 0x3e8   : > { %4371 = vmatmul.mubr.msk.f32.gmra.mxu1 %vm2434_vm12, %v4369_v36  ;;  %v2755_v38 = vpop.permute.xlu1 %2754  ;;  %v2938_v58 = vsel %vm1036_vm5, %v2933_v37, %v2935_v33  ;;  %v4010_v37 = vld [vmem:[%s6024_s7 + $0x68] sm:$0xff] }
 0x3e9   : > { %4604 = vmatprep.mubr.msk.f32.mxu1 %vm2434_vm12, %v4368_v31  ;;  %v2760_v45 = vsel %vm872_vm4, %v2755_v38, %v2757_v35  ;;  %v4015_v31 = vld [vmem:[%s6024_s7 + $0x90] sm:$0xff]  ;;  %v4012_v35 = vld [vmem:[%s6024_s7 + $0x78] sm:$0xff]  ;;  %v4009_v38 = vld [vmem:[%s6024_s7 + $0x60] sm:$0xff] }
 0x3eb   : > { %v5648_v39 = vpop.permute.xlu0 %3114 }
 0x3ec   : > { %4605 = vmatmul.mubr.msk.f32.vlgmr.msra.gmra.mxu1 %vm2434_vm12, %v4369_v36  ;;  %v2937_v40 = vpop.permute.xlu1 %2936  ;;  %v4011_v36 = vld [vmem:[%s6024_s7 + $0x70] sm:$0xff] }
 0x3ed   : > { %2630 = vmatpush1.msra.mxu1 %v5578_v12  ;;  %4617 = vmatprep.subr.mxu0 %v2937_v40  ;;  %v2939_v53 = vsel %vm1036_vm5, %v2935_v33, %v2937_v40  ;;  %v4013_v33 = vld [vmem:[%s6024_s7 + $0x80] sm:$0xff] }
 0x3ee   : > { %2801 = vmatprep.subr.mxu1 %v2761_v42  ;;  %4618 = vmatpush3.msra.mxu0 %v2937_v40  ;;  %v4007_v40 = vld [vmem:[%s6024_s7 + $0x50] sm:$0xff]  ;;  %v4005_v42 = vld [vmem:[%s6024_s7 + $0x40] sm:$0xff] }
 0x3ef   : > { %2663 = vmatprep.mubr.f32.mxu1 %v4677_v34  ;;  %v5662_v44 = vpop.permute.xlu0 %3290  ;;  %4620 = vmatmul.mubr.msk.f32.vlgmr.msra.gmra.mxu0 %vm2434_vm12, %v4385_v41 }
 0x3f0   : > { %4374 = vmatmul.mubr.msk.f32.vlgmr.msra.gmra.mxu1 %vm2434_vm12, %v5586_v19  ;;  %v3113_v46 = vpop.permute.xlu1 %3112  ;;  %4629 = vmatprep.mubr.msk.f32.mxu0 %vm2434_vm12, %v5659_v43  ;;  %v4027_v19 = vld [vmem:[%s6024_s7 + $0xf0] sm:$0xff] }
 0x3f1   : > { %2802 = vmatpush1.msra.mxu1 %v2760_v45  ;;  %2669 = vmatprep.mubr.f32.mxu1 %v4677_v34  ;;  %v3117_v60 = vsel %vm1200_vm7, %v3113_v46, %v5648_v39  ;;  %v4002_v45 = vld [vmem:[%s6024_s7 + $0x28] sm:$0xff] }
 0x3f2   : > { %4612 = vmatprep.subr.mxu1 %v2759_v28 }
 0x3f3   : > { %v5671_v47 = vpop.permute.xlu0 %3288 }
 0x3f4   : > { %4375 = vmatmul.mubr.msk.f32.gmra.mxu1 %vm2434_vm12, %v5593_v23  ;;  %v3111_v48 = vpop.permute.xlu1 %3110  ;;  %v3294_v11 = vsel %vm1364_vm6, %v5671_v47, %v5662_v44  ;;  %v4023_v23 = vld [vmem:[%s6024_s7 + $0xd0] sm:$0xff]  ;;  %v4000_v47 = vld [vmem:[%s6024_s7 + $0x18] sm:$0xff] }
 0x3f5   : > { %2835 = vmatprep.mubr.f32.mxu1 %v4677_v34  ;;  %v3116_v62 = vsel %vm1200_vm7, %v3111_v48, %v3113_v46  ;;  %v4001_v46 = vld [vmem:[%s6024_s7 + $0x20] sm:$0xff]  ;;  %v3999_v48 = vld [vmem:[%s6024_s7 + $0x10] sm:$0xff] }
 0x3f7   : > { %v5679_v50 = vpop.permute.xlu0 %3470 }
 0x3f8   : > { %4380 = vmatmul.mubr.msk.f32.vlgmr.msra.gmra.mxu1 %vm2434_vm12, %v4378_v49  ;;  %v3293_v51 = vpop.permute.xlu1 %3292 }
 0x3f9   : > { %4613 = vmatpush3.msra.mxu1 %v2759_v28  ;;  %4627 = vmatprep.subr.mxu0 %v3293_v51  ;;  %v3295_v8 = vsel %vm1364_vm6, %v5662_v44, %v3293_v51  ;;  %v4018_v28 = vld [vmem:[%s6024_s7 + $0xa8] sm:$0xff]  ;;  %v4003_v44 = vld [vmem:[%s6024_s7 + $0x30] sm:$0xff] }
 0x3fa   : > { %2979 = vmatprep.subr.mxu1 %v2939_v53  ;;  %4628 = vmatpush3.msra.mxu0 %v3293_v51  ;;  %v4060_v51 = vld [vmem:[%s6024_s7 + $0x1f8] sm:$0xff]  ;;  %v4058_v53 = vld [vmem:[%s6024_s7 + $0x1e8] sm:$0xff] }
 0x3fb   : > { %2841 = vmatprep.mubr.f32.mxu1 %v4677_v34  ;;  %4630 = vmatmul.mubr.msk.f32.vlgmr.msra.gmra.mxu0 %vm2434_vm12, %v5685_v52  ;;  %v5699_v56 = vpop.permute.xlu0 %3646 }
 0x3fc   : > { %4381 = vmatmul.mubr.msk.f32.gmra.mxu1 %vm2434_vm12, %v4379_v54  ;;  %v3469_v57 = vpop.permute.xlu1 %3468  ;;  %4639 = vmatprep.mubr.msk.f32.mxu0 %vm2434_vm12, %v5694_v55 }
 0x3fd   : > { %4614 = vmatprep.mubr.msk.f32.mxu1 %vm2434_vm12, %v4378_v49  ;;  %v3473_v12 = vsel %vm1528_vm8, %v3469_v57, %v5679_v50  ;;  %v3998_v49 = vld [vmem:[%s6024_s7 + $0x8] sm:$0xff] }
 0x3ff   : > { %v3645_v61 = vpop.permute.xlu0 %3644 }
 0x400   : > { %4615 = vmatmul.mubr.msk.f32.vlgmr.msra.gmra.mxu1 %vm2434_vm12, %v4379_v54  ;;  %v3467_v59 = vpop.permute.xlu1 %3466  ;;  %v3650_v17 = vsel %vm1692_vm9, %v3645_v61, %v5699_v56  ;;  %v4057_v54 = vld [vmem:[%s6024_s7 + $0x1e0] sm:$0xff]  ;;  %v4050_v61 = vld [vmem:[%s6024_s7 + $0x1a8] sm:$0xff] }
 0x401   : > { %2980 = vmatpush1.msra.mxu1 %v2938_v58  ;;  %3013 = vmatprep.mubr.f32.mxu1 %v4677_v34  ;;  %v3472_v13 = vsel %vm1528_vm8, %v3467_v59, %v3469_v57  ;;  %v4054_v57 = vld [vmem:[%s6024_s7 + $0x1c8] sm:$0xff]  ;;  %v4053_v58 = vld [vmem:[%s6024_s7 + $0x1c0] sm:$0xff]  ;;  %v4052_v59 = vld [vmem:[%s6024_s7 + $0x1b8] sm:$0xff] }
 0x402   : > { %3157 = vmatprep.subr.mxu1 %v3117_v60  ;;  %v4051_v60 = vld [vmem:[%s6024_s7 + $0x1b0] sm:$0xff] }
 0x403   : > { %v3827_v1 = vpop.permute.xlu0 %3826 }
 0x404   : > { %4386 = vmatmul.mubr.msk.f32.vlgmr.msra.gmra.mxu1 %vm2434_vm12, %v5609_v24  ;;  %v3649_v63 = vpop.permute.xlu1 %3648  ;;  %v4022_v24 = vld [vmem:[%s6024_s7 + $0xc8] sm:$0xff] }
 0x405   : > { %3158 = vmatpush1.msra.mxu1 %v3116_v62  ;;  %4637 = vmatprep.subr.mxu0 %v3649_v63  ;;  %v3651_v15 = vsel %vm1692_vm9, %v5699_v56, %v3649_v63  ;;  %v4055_v56 = vld [vmem:[%s6024_s7 + $0x1d0] sm:$0xff]  ;;  %v4049_v62 = vld [vmem:[%s6024_s7 + $0x1a0] sm:$0xff] }
 0x406   : > { %4622 = vmatprep.subr.mxu1 %v5648_v39  ;;  %4638 = vmatpush3.msra.mxu0 %v3649_v63  ;;  %v4048_v63 = vld [vmem:[%s6024_s7 + $0x198] sm:$0xff] }
 0x407   : > { %3019 = vmatprep.mubr.f32.mxu1 %v4677_v34  ;;  %4640 = vmatmul.mubr.msk.f32.vlgmr.msra.gmra.mxu0 %vm2434_vm12, %v4409_v0 }
 0x408   : > { %4387 = vmatmul.mubr.msk.f32.gmra.mxu1 %vm2434_vm12, %v4385_v41  ;;  %v3825_v2 = vpop.permute.xlu1 %3824  ;;  %3903 = vmatprep.mubr.f32.mxu0 %v4677_v34  ;;  %v4006_v41 = vld [vmem:[%s6024_s7 + $0x48] sm:$0xff] }
 0x409   : > { %v3829_v3 = vsel %vm1856_vm10, %v3825_v2, %v3827_v1  ;;  %3191 = vmatprep.mubr.f32.mxu1 %v4677_v34 }
 0x40a   : > { %3869 = vmatprep.subr.mxu0 %v3829_v3  ;;  %v4044_v3 = vld [vmem:[%s6024_s7 + $0x178] sm:$0xff] }
 0x40c   : > { %4392 = vmatmul.mubr.msk.f32.vlgmr.msra.gmra.mxu1 %vm2434_vm12, %v4390_v4  ;;  %v3823_v5 = vpop.permute.xlu1 %3822 }
 0x40d   : > { %4623 = vmatpush3.msra.mxu1 %v5648_v39  ;;  %v3828_v7 = vsel %vm1856_vm10, %v3823_v5, %v3825_v2  ;;  %3197 = vmatprep.mubr.f32.mxu1 %v4677_v34  ;;  %v4008_v39 = vld [vmem:[%s6024_s7 + $0x58] sm:$0xff]  ;;  %v4045_v2 = vld [vmem:[%s6024_s7 + $0x180] sm:$0xff]  ;;  %v4042_v5 = vld [vmem:[%s6024_s7 + $0x168] sm:$0xff] }
 0x40e   : > { %3335 = vmatprep.subr.mxu1 %v3295_v8  ;;  %3870 = vmatpush1.msra.mxu0 %v3828_v7  ;;  %v4040_v7 = vld [vmem:[%s6024_s7 + $0x158] sm:$0xff]  ;;  %v4039_v8 = vld [vmem:[%s6024_s7 + $0x150] sm:$0xff] }
 0x40f   : > { %4416 = vmatmul.mubr.msk.f32.vlgmr.msra.gmra.mxu0 %vm2434_vm12, %v4414_v6  ;;  %4087 = vmatprep.subr.mxu0 %v4028_v18  ;;  %v4030_v18 = vld [vmem:[%s6024_s7 + $0x108] sm:$0xff] }
 0x410   : > { %4393 = vmatmul.mubr.msk.f32.gmra.mxu1 %vm2434_vm12, %v4391_v9  ;;  %3909 = vmatprep.mubr.f32.mxu0 %v4677_v34 }
 0x411   : > { %4624 = vmatprep.mubr.msk.f32.mxu1 %vm2434_vm12, %v4390_v4  ;;  %4088 = vmatpush1.msra.mxu0 %v4027_v19  ;;  %v4043_v4 = vld [vmem:[%s6024_s7 + $0x170] sm:$0xff] }
 0x412   : > { %4089 = vmatprep.subr.mxu0 %v4026_v20  ;;  %v4067_v19 = vld [vmem:[%s6024_s7 + $0x230] sm:$0xff]  ;;  %v4029_v20 = vld [vmem:[%s6024_s7 + $0x100] sm:$0xff] }
 0x413   : > { %4417 = vmatmul.mubr.msk.f32.gmra.mxu0 %vm2434_vm12, %v4415_v10 }
 0x414   : > { %4625 = vmatmul.mubr.msk.f32.vlgmr.msra.gmra.mxu1 %vm2434_vm12, %v4391_v9  ;;  %4090 = vmatpush1.msra.mxu0 %v4025_v21  ;;  %v4038_v9 = vld [vmem:[%s6024_s7 + $0x148] sm:$0xff] }
 0x415   : > { %3336 = vmatpush1.msra.mxu1 %v3294_v11  ;;  %3369 = vmatprep.mubr.f32.mxu1 %v4677_v34  ;;  %v4036_v11 = vld [vmem:[%s6024_s7 + $0x138] sm:$0xff]  ;;  %v4066_v21 = vld [vmem:[%s6024_s7 + $0x228] sm:$0xff] }
 0x416   : > { %3513 = vmatprep.subr.mxu1 %v3473_v12  ;;  %4091 = vmatprep.subr.mxu0 %v4024_v22  ;;  %v4035_v12 = vld [vmem:[%s6024_s7 + $0x130] sm:$0xff]  ;;  %v4065_v22 = vld [vmem:[%s6024_s7 + $0x220] sm:$0xff] }
 0x417   : > { %4092 = vmatpush1.msra.mxu0 %v4023_v23  ;;  %v4064_v23 = vld [vmem:[%s6024_s7 + $0x218] sm:$0xff] }
 0x418   : > { %4398 = vmatmul.mubr.msk.f32.vlgmr.msra.gmra.mxu1 %vm2434_vm12, %v5659_v43  ;;  %4093 = vmatprep.subr.mxu0 %v4022_v24  ;;  %v4004_v43 = vld [vmem:[%s6024_s7 + $0x38] sm:$0xff]  ;;  %v4063_v24 = vld [vmem:[%s6024_s7 + $0x210] sm:$0xff] }
 0x419   : > { %3514 = vmatpush1.msra.mxu1 %v3472_v13  ;;  %3375 = vmatprep.mubr.f32.mxu1 %v4677_v34  ;;  %v4034_v13 = vld [vmem:[%s6024_s7 + $0x128] sm:$0xff] }
 0x41a   : > { %4632 = vmatprep.subr.mxu1 %v5679_v50  ;;  %4094 = vmatpush1.msra.mxu0 %v4021_v25  ;;  %v4062_v25 = vld [vmem:[%s6024_s7 + $0x208] sm:$0xff] }
 0x41b   : > { %4095 = vmatprep.subr.mxu0 %v4020_v26  ;;  %v4061_v26 = vld [vmem:[%s6024_s7 + $0x200] sm:$0xff] }
 0x41c   : > { %4399 = vmatmul.mubr.msk.f32.gmra.mxu1 %vm2434_vm12, %v5685_v52  ;;  %4096 = vmatpush1.msra.mxu0 %v4019_v27  ;;  %v4059_v52 = vld [vmem:[%s6024_s7 + $0x1f0] sm:$0xff]  ;;  %v4070_v27 = vld [vmem:[%s6022_s5 + $0x8] sm:$0xff] }
 0x41d   : > { %3547 = vmatprep.mubr.f32.mxu1 %v4677_v34  ;;  %4097 = vmatprep.subr.mxu0 %v4018_v28 }
 0x41e   : > { %4098 = vmatpush1.msra.mxu0 %v4017_v29  ;;  %4078 = vperm.xlu1 %4667, %v4070_v27  }
 0x41f   : > { %4099 = vmatprep.subr.mxu0 %v4016_v30 }
 0x420   : > { %4404 = vmatmul.mubr.msk.f32.vlgmr.msra.gmra.mxu1 %vm2434_vm12, %v4402_v14  ;;  %4100 = vmatpush1.msra.mxu0 %v4015_v31 }
 0x421   : > { %4633 = vmatpush3.msra.mxu1 %v5679_v50  ;;  %3553 = vmatprep.mubr.f32.mxu1 %v4677_v34  ;;  %v3997_v50 = vld [vmem:[%s6024_s7] sm:$0xff] }
 0x422   : > { %3691 = vmatprep.subr.mxu1 %v3651_v15  ;;  %4101 = vmatprep.subr.mxu0 %v4014_v32  ;;  %v4032_v15 = vld [vmem:[%s6024_s7 + $0x118] sm:$0xff] }
 0x423   : > { %4102 = vmatpush1.msra.mxu0 %v4013_v33 }
 0x424   : > { %4405 = vmatmul.mubr.msk.f32.gmra.mxu1 %vm2434_vm12, %v4403_v16  ;;  %4103 = vmatprep.subr.mxu0 %v4012_v35 }
 0x425   : > { %4634 = vmatprep.mubr.msk.f32.mxu1 %vm2434_vm12, %v4402_v14  ;;  %4104 = vmatpush1.msra.mxu0 %v4011_v36  ;;  %v4033_v14 = vld [vmem:[%s6024_s7 + $0x120] sm:$0xff] }
 0x426   : > { %4105 = vmatprep.subr.mxu0 %v4010_v37 }
 0x427   : > { %4106 = vmatpush1.msra.mxu0 %v4009_v38 }
 0x428   : > { %4635 = vmatmul.mubr.msk.f32.vlgmr.msra.gmra.mxu1 %vm2434_vm12, %v4403_v16  ;;  %4107 = vmatprep.subr.mxu0 %v4008_v39  ;;  %v4031_v16 = vld [vmem:[%s6024_s7 + $0x110] sm:$0xff] }
 0x429   : > { %3692 = vmatpush1.msra.mxu1 %v3650_v17  ;;  %3725 = vmatprep.mubr.f32.mxu1 %v4677_v34  ;;  %v4068_v17 = vld [vmem:[%s6024_s7 + $0x238] sm:$0xff] }
 0x42a   : > { %4642 = vmatprep.subr.mxu1 %v3827_v1  ;;  %4108 = vmatpush1.msra.mxu0 %v4007_v40 }
 0x42b   : > { %4109 = vmatprep.subr.mxu0 %v4006_v41 }
 0x42c   : > { %4410 = vmatmul.mubr.msk.f32.vlgmr.msra.gmra.mxu1 %vm2434_vm12, %v5694_v55  ;;  %4110 = vmatpush1.msra.mxu0 %v4005_v42  ;;  %v4056_v55 = vld [vmem:[%s6024_s7 + $0x1d8] sm:$0xff] }
 0x42d   : > { %4643 = vmatpush3.msra.mxu1 %v3827_v1  ;;  %3731 = vmatprep.mubr.f32.mxu1 %v4677_v34  ;;  %v4046_v1 = vld [vmem:[%s6024_s7 + $0x188] sm:$0xff] }
 0x42e   : > { %4111 = vmatprep.subr.mxu0 %v4004_v43  ;;  %4188 = vmatprep.subr.mxu1 %v4068_v17 }
 0x42f   : > { %4112 = vmatpush1.msra.mxu0 %v4003_v44 }
 0x430   : > { %4411 = vmatmul.mubr.msk.f32.gmra.mxu1 %vm2434_vm12, %v4409_v0  ;;  %4113 = vmatprep.subr.mxu0 %v4002_v45  ;;  %v4047_v0 = vld [vmem:[%s6024_s7 + $0x190] sm:$0xff] }
 0x431   : > { %4644 = vmatprep.mubr.msk.f32.mxu1 %vm2434_vm12, %v4414_v6  ;;  %4114 = vmatpush1.msra.mxu0 %v4001_v46  ;;  %v4041_v6 = vld [vmem:[%s6024_s7 + $0x160] sm:$0xff] }
 0x432   : > { %4115 = vmatprep.subr.mxu0 %v4000_v47 }
 0x433   : > { %4116 = vmatpush1.msra.mxu0 %v3999_v48 }
 0x434   : > { %4645 = vmatmul.mubr.msk.f32.vlgmr.msra.gmra.mxu1 %vm2434_vm12, %v4415_v10  ;;  %4117 = vmatprep.subr.mxu0 %v3998_v49  ;;  %v4037_v10 = vld [vmem:[%s6024_s7 + $0x140] sm:$0xff]  ;;  %v4611_v49 = vpop.f32.mrf.mxu0 }
 0x435   : > { %4228 = vmatprep.mubr.f32.mxu1 %v4677_v34  ;;  %4118 = vmatpush1.msra.mxu0 %v3997_v50 }
 0x436   : > { %4119 = vmatprep.subr.mxu0 %v4060_v51  ;;  %4189 = vmatpush1.msra.mxu1 %v4067_v19 }
 0x437   : > { %4120 = vmatpush2.msra.mxu0 %v4059_v52  ;;  %4190 = vmatprep.subr.mxu1 %v4066_v21  ;;  %v2742_v52 = vpop.f32.mrf.mxu0 }
 0x438   : > { %4121 = vmatprep.subr.mxu0 %v4058_v53  ;;  %4191 = vmatpush1.msra.mxu1 %v4065_v22 }
 0x439   : > { %4122 = vmatpush2.msra.mxu0 %v4057_v54  ;;  %4192 = vmatprep.subr.mxu1 %v4064_v23 }
 0x43a   : > { %4123 = vmatprep.subr.mxu0 %v4056_v55  ;;  %4193 = vmatpush1.msra.mxu1 %v4063_v24 }
 0x43b   : > { %4124 = vmatpush2.msra.mxu0 %v4055_v56  ;;  %4194 = vmatprep.subr.mxu1 %v4062_v25 }
 0x43c   : > { %4125 = vmatprep.subr.mxu0 %v4054_v57  ;;  %4195 = vmatpush1.msra.mxu1 %v4061_v26 }
 0x43d   : > { %4126 = vmatpush2.msra.mxu0 %v4053_v58 }
 0x43e   : > { %4127 = vmatprep.subr.mxu0 %v4052_v59 }
 0x43f   : > { %4128 = vmatpush2.msra.mxu0 %v4051_v60 }
 0x440   : > { %4129 = vmatprep.subr.mxu0 %v4050_v61 }
 0x441   : > { %4130 = vmatpush2.msra.mxu0 %v4049_v62 }
 0x442   : > { %4131 = vmatprep.subr.mxu0 %v4048_v63 }
 0x443   : > { %4132 = vmatpush2.msra.mxu0 %v4047_v0 }
 0x444   : > { %4133 = vmatprep.subr.mxu0 %v4046_v1 }
 0x445   : > { %4134 = vmatpush2.msra.mxu0 %v4045_v2 }
 0x446   : > { %4135 = vmatprep.subr.mxu0 %v4044_v3 }
 0x447   : > { %4136 = vmatpush2.msra.mxu0 %v4043_v4 }
 0x448   : > { %4137 = vmatprep.subr.mxu0 %v4042_v5 }
 0x449   : > { %4138 = vmatpush2.msra.mxu0 %v4041_v6 }
 0x44a   : > { %4139 = vmatprep.subr.mxu0 %v4040_v7 }
 0x44b   : > { %4140 = vmatpush2.msra.mxu0 %v4039_v8 }
 0x44c   : > { %4141 = vmatprep.subr.mxu0 %v4038_v9 }
 0x44d   : > { %4142 = vmatpush2.msra.mxu0 %v4037_v10 }
 0x44e   : > { %4143 = vmatprep.subr.mxu0 %v4036_v11 }
 0x44f   : > { %4144 = vmatpush2.msra.mxu0 %v4035_v12 }
 0x450   : > { %4145 = vmatprep.subr.mxu0 %v4034_v13 }
 0x451   : > { %4146 = vmatpush2.msra.mxu0 %v4033_v14 }
 0x452   : > { %4147 = vmatprep.subr.mxu0 %v4032_v15 }
 0x453   : > { %4148 = vmatpush2.msra.mxu0 %v4031_v16 }
 0x454   : > { %4149 = vmatprep.subr.mxu0 %v4030_v18 }
 0x455   : > { %4150 = vmatpush2.msra.mxu0 %v4029_v20 }
 0x4a4   : > { %v2507_v28 = vpop.f32.mrf.mxu1 }
 0x4a6   : > { %v2509_v29 = vpop.f32.mrf.mxu1 }
 0x4a8   : > { %v2513_v30 = vpop.f32.mrf.mxu1 }
 0x4aa   : > { %v2515_v31 = vpop.f32.mrf.mxu1 }
 0x4ac   : > { %v4606_v32 = vpop.f32.mrf.mxu1 }
 0x4ad   : > { %v2748_v16 = vadd.f32 %v4611_v49, %v4606_v32 }
 0x4ae   : > { %v2584_v33 = vpop.f32.mrf.mxu1 }
 0x4af   : > { %v4621_v54 = vpop.f32.mrf.mxu0  ;;  %v2743_v6 = vadd.f32 %v2742_v52, %v2584_v33 }
 0x4b0   : > { %v2665_v35 = vpop.f32.mrf.mxu1 }
 0x4b1   : > { %v3092_v57 = vpop.f32.mrf.mxu0  ;;  %v2666_v3 = vadd.f32 %v2665_v35, %v2507_v28 }
 0x4b2   : > { %v2667_v36 = vpop.f32.mrf.mxu1 }
 0x4b3   : > { %v2668_v7 = vadd.f32 %v2667_v36, %v2509_v29 }
 0x4b4   : > { %v2671_v37 = vpop.f32.mrf.mxu1 }
 0x4b5   : > { %v2672_v12 = vadd.f32 %v2671_v37, %v2513_v30 }
 0x4b6   : > { %v2673_v38 = vpop.f32.mrf.mxu1 }
 0x4b7   : > { %v2674_v17 = vadd.f32 %v2673_v38, %v2515_v31 }
 0x4b8   : > { %v2837_v39 = vpop.f32.mrf.mxu1 }
 0x4b9   : > { %v2923_v8 = vadd.f32 %v2837_v39, %v2666_v3 }
 0x4ba   : > { %v2839_v40 = vpop.f32.mrf.mxu1 }
 0x4bb   : > { %v4631_v59 = vpop.f32.mrf.mxu0  ;;  %v2924_v10 = vadd.f32 %v2839_v40, %v2668_v7 }
 0x4bc   : > { %v2843_v41 = vpop.f32.mrf.mxu1 }
 0x4bd   : > { %v3448_v62 = vpop.f32.mrf.mxu0  ;;  %v2926_v19 = vadd.f32 %v2843_v41, %v2672_v12 }
 0x4be   : > { %v2845_v42 = vpop.f32.mrf.mxu1 }
 0x4bf   : > { %v2927_v22 = vadd.f32 %v2845_v42, %v2674_v17 }
 0x4c0   : > { %v4616_v43 = vpop.f32.mrf.mxu1 }
 0x4c1   : > { %v2928_v23 = vadd.f32 %v4616_v43, %v2748_v16 }
 0x4c2   : > { %v2914_v44 = vpop.f32.mrf.mxu1 }
 0x4c3   : > { %v2925_v11 = vadd.f32 %v2914_v44, %v2743_v6  ;;  %v3106_v32 = vadd.f32 %v4621_v54, %v2928_v23 }
 0x4c4   : > { %v3015_v45 = vpop.f32.mrf.mxu1 }
 0x4c5   : > { %v3101_v13 = vadd.f32 %v3015_v45, %v2923_v8  ;;  %v3103_v24 = vadd.f32 %v3092_v57, %v2925_v11  ;;  %v4074_v8 = vpop.permute.xlu0 %4073 }
 0x4c6   : > { %v3017_v46 = vpop.f32.mrf.mxu1 }
 0x4c7   : > { %v6004_v1 = vpop.f32.mrf.mxu0  ;;  %v3102_v18 = vadd.f32 %v3017_v46, %v2924_v10  ;;  %v4079_v10 = vpop.permute.xlu1 %4078 }
 0x4c8   : > { %v3021_v47 = vpop.f32.mrf.mxu1 }
 0x4c9   : > { %v3804_v5 = vpop.f32.mrf.mxu0  ;;  %v3104_v26 = vadd.f32 %v3021_v47, %v2926_v19 }
 0x4ca   : > { %v3023_v48 = vpop.f32.mrf.mxu1 }
 0x4cb   : > { %v3105_v33 = vadd.f32 %v3023_v48, %v2927_v22 }
 0x4cc   : > { %v3193_v50 = vpop.f32.mrf.mxu1 }
 0x4cd   : > { %v3279_v20 = vadd.f32 %v3193_v50, %v3101_v13 }
 0x4ce   : > { %v3195_v51 = vpop.f32.mrf.mxu1 }
 0x4cf   : > { %v3905_v15 = vpop.f32.mrf.mxu0  ;;  %v3280_v25 = vadd.f32 %v3195_v51, %v3102_v18 }
 0x4d0   : > { %v3199_v53 = vpop.f32.mrf.mxu1 }
 0x4d1   : > { %v3907_v29 = vpop.f32.mrf.mxu0  ;;  %v3282_v36 = vadd.f32 %v3199_v53, %v3104_v26 }
 0x4d2   : > { %v3201_v55 = vpop.f32.mrf.mxu1 }
 0x4d3   : > { %v3283_v31 = vadd.f32 %v3201_v55, %v3105_v33  ;;  %v3911_v42 = vpop.f32.mrf.mxu0 }
 0x4d4   : > { %v4626_v56 = vpop.f32.mrf.mxu1 }
 0x4d5   : > { %v3284_v43 = vadd.f32 %v4626_v56, %v3106_v32 }
 0x4d6   : > { %v3270_v58 = vpop.f32.mrf.mxu1 }
 0x4d7   : > { %v3281_v35 = vadd.f32 %v3270_v58, %v3103_v24  ;;  %v3462_v54 = vadd.f32 %v4631_v59, %v3284_v43 }
 0x4d8   : > { %v3371_v60 = vpop.f32.mrf.mxu1 }
 0x4d9   : > { %v3457_v27 = vadd.f32 %v3371_v60, %v3279_v20  ;;  %v3459_v45 = vadd.f32 %v3448_v62, %v3281_v35  ;;  %v3913_v60 = vpop.f32.mrf.mxu0 }
 0x4da   : > { %v3373_v61 = vpop.f32.mrf.mxu1 }
 0x4db   : > { %v3458_v30 = vadd.f32 %v3373_v61, %v3280_v25 }
 0x4dc   : > { %v3377_v63 = vpop.f32.mrf.mxu1 }
 0x4dd   : > { %v3460_v40 = vadd.f32 %v3377_v63, %v3282_v36 }
 0x4de   : > { %v3379_v0 = vpop.f32.mrf.mxu1 }
 0x4df   : > { %v3461_v46 = vadd.f32 %v3379_v0, %v3283_v31 }
 0x4e0   : > { %v3549_v2 = vpop.f32.mrf.mxu1 }
 0x4e1   : > { %v3635_v37 = vadd.f32 %v3549_v2, %v3457_v27 }
 0x4e2   : > { %v3551_v4 = vpop.f32.mrf.mxu1 }
 0x4e3   : > { %v3636_v38 = vadd.f32 %v3551_v4, %v3458_v30 }
 0x4e4   : > { %v3555_v9 = vpop.f32.mrf.mxu1 }
 0x4e5   : > { %v3638_v49 = vadd.f32 %v3555_v9, %v3460_v40 }
 0x4e6   : > { %v3557_v14 = vpop.f32.mrf.mxu1 }
 0x4e7   : > { %v3639_v51 = vadd.f32 %v3557_v14, %v3461_v46 }
 0x4e8   : > { %v4636_v21 = vpop.f32.mrf.mxu1 }
 0x4e9   : > { %v3640_v63 = vadd.f32 %v4636_v21, %v3462_v54 }
 0x4ea   : > { %v3626_v28 = vpop.f32.mrf.mxu1 }
 0x4eb   : > { %v3637_v48 = vadd.f32 %v3626_v28, %v3459_v45  ;;  %v3818_v4 = vadd.f32 %v6004_v1, %v3640_v63 }
 0x4ec   : > { %v3727_v39 = vpop.f32.mrf.mxu1 }
 0x4ed   : > { %v3813_v41 = vadd.f32 %v3727_v39, %v3635_v37  ;;  %v3815_v2 = vadd.f32 %v3804_v5, %v3637_v48 }
 0x4ee   : > { %v3729_v44 = vpop.f32.mrf.mxu1 }
 0x4ef   : > { %v3814_v47 = vadd.f32 %v3729_v44, %v3636_v38  ;;  %v3991_v57 = vadd.f32 %v3905_v15, %v3813_v41 }
 0x4f0   : > { %v3733_v50 = vpop.f32.mrf.mxu1 }
 0x4f1   : > { %v3992_v52 = vadd.f32 %v3907_v29, %v3814_v47  ;;  %v3816_v53 = vadd.f32 %v3733_v50, %v3638_v49 }
 0x4f2   : > { %v3735_v58 = vpop.f32.mrf.mxu1 }
 0x4f3   : > { %v3817_v55 = vadd.f32 %v3735_v58, %v3639_v51  ;;  %4151 = vmatprep.mubr.f32.mxu0 %v3992_v52  ;;  %v3994_v62 = vadd.f32 %v3911_v42, %v3816_v53 }
 0x4f4   : > { %v4646_v61 = vpop.f32.mrf.mxu1  ;;  %4152 = vmatmul.mubr.f32.vlgmr.msra.gmra.mxu0 %v3991_v57 }
 0x4f5   : > { %v3995_v56 = vadd.f32 %v3913_v60, %v3817_v55  ;;  %v3996_v59 = vadd.f32 %v4646_v61, %v3818_v4 }
 0x4f6   : > { %v3982_v0 = vpop.f32.mrf.mxu1 }
 0x4f7   : > { %v3993_v3 = vadd.f32 %v3982_v0, %v3815_v2  ;;  %4157 = vmatprep.mubr.f32.mxu0 %v3995_v56 }
 0x4f8   : > { %4158 = vmatmul.mubr.f32.gmra.mxu0 %v3994_v62 }
 0x4f9   : > { %4420 = vmatmul.mubr.msk.f32.vlgmr.msra.gmra.mxu1 %vm2129_vm11, %v3993_v3 }
 0x4fa   : > { %4234 = vmatprep.mubr.f32.mxu1 %v4677_v34 }
 0x4fd   : > { %4421 = vmatmul.mubr.msk.f32.gmra.mxu1 %vm2129_vm11, %v3996_v59 }
 0x5b4   : > { %v4153_v6 = vpop.f32.mrf.mxu0 }
 0x5b5   : > { %v4154_v5 = vadd.f32 %v4153_v6, %v4074_v8 }
 0x5b6   : > { %v4155_v7 = vpop.f32.mrf.mxu0 }
 0x5b7   : > { %v4156_v12 = vadd.f32 %v4155_v7, %v4074_v8 }
 0x5b8   : > { %v4159_v9 = vpop.f32.mrf.mxu0 }
 0x5b9   : > { %v4230_v11 = vpop.f32.mrf.mxu1  ;;  %v4160_v34 = vadd.f32 %v4159_v9, %v4079_v10 }
 0x5ba   : > { %v4231_v13 = vadd.f32 %v4230_v11, %v4154_v5  ;;  %v4161_v1 = vpop.f32.mrf.mxu0 }
 0x5bb   : > { %v4232_v14 = vpop.f32.mrf.mxu1  ;;  %v4162_v18 = vadd.f32 %v4161_v1, %v4079_v10 }
 0x5bc   : > { %v4241_v15 = vmax.f32 %v4231_v13, 0.0  ;;  %v4233_v16 = vadd.f32 %v4232_v14, %v4156_v12 }
 0x5bd   : > { %v4236_v17 = vpop.f32.mrf.mxu1 }
 0x5be   : > { %4245 = vst [vmem:[%s305_s26] sm:$0xff] %v4241_v15  ;;  %v4242_v19 = vmax.f32 %v4233_v16, 0.0  ;;  %v4237_v20 = vadd.f32 %v4236_v17, %v4160_v34 }
 0x5bf   : > { %v4238_v21 = vpop.f32.mrf.mxu1 }
 0x5c0   : > { %4246 = vst [vmem:[%s305_s26 + $0x8] sm:$0xff] %v4242_v19  ;;  %v4243_v22 = vmax.f32 %v4237_v20, 0.0  ;;  %v4239_v23 = vadd.f32 %v4238_v21, %v4162_v18 }
 0x5c2   : > { %4247 = vst [vmem:[%s305_s26 + $0x10] sm:$0xff] %v4243_v22  ;;  %v4244_v24 = vmax.f32 %v4239_v23, 0.0 }
 0x5c4   : > { %4248 = vst [vmem:[%s305_s26 + $0x18] sm:$0xff] %v4244_v24 }
 0x5c5 PF: > { %s18_s27 = sadd.s32 1, %s4675_s27  }
 0x5c6   : > { %p15_p4 = scmp.ge.s32.totalorder %s18_s27, 4  }
 0x5c8   :  { %17 = sbr.rel (!%p15_p4) target bundleno = 1 (0x1), region = 98 }

</bundles_post_ra>
